<compile_context>
chip_gen: v7x
topology: tpu7x:2x2x1
jax: 0.10.0
libtpu: 0.0.40
codegen_flags: <defaults>
</compile_context>

<pallas_src>
import functools

import jax
import jax.numpy as jnp
from jax.experimental import pallas as pl
from jax.experimental.pallas import tpu as pltpu


def _fused_rnn_kernel(*args, num_layers, chunk, nonlinearity, compute_dtype):
    """Fused multi-layer Elman RNN over one chunk of `chunk` timesteps.

    args = [gates0, whh0_T, (wih_l_T, bias_l, whh_l_T) for l in 1..L-1,
            out_ref, hn_ref, h_scratch]
    gates0 already contains x @ W_ih_0^T + (b_ih_0 + b_hh_0)  (hoisted GEMM).
    All weight refs are pre-transposed -> no in-kernel .T.
    """
    n_in = 2 + 3 * (num_layers - 1)
    in_refs = args[:n_in]
    out_ref = args[n_in]
    hn_ref = args[n_in + 1]
    h_ref = args[n_in + 2]

    gates_ref = in_refs[0]
    whh_refs = [in_refs[1]]
    wih_refs = [None]
    bias_refs = [None]
    for l in range(1, num_layers):
        base = 2 + 3 * (l - 1)
        wih_refs.append(in_refs[base])
        bias_refs.append(in_refs[base + 1])
        whh_refs.append(in_refs[base + 2])

    c = pl.program_id(0)

    @pl.when(c == 0)
    def _():
        h_ref[...] = jnp.zeros_like(h_ref)

    def act(pre):
        if nonlinearity == "tanh":
            return jnp.tanh(pre)
        return jnp.maximum(pre, 0.0)

    def step(i, carry):
        # Layer 0: only the (B, H) x (H, H) recurrent matmul is on the serial
        # critical path; the input projection + bias were hoisted into gates0.
        pre = gates_ref[i] + jnp.dot(
            h_ref[0].astype(compute_dtype), whh_refs[0][...],
            preferred_element_type=jnp.float32)
        h_new = act(pre)
        h_ref[0] = h_new
        layer_in = h_new
        # Remaining layers consume the same-timestep output of the layer below,
        # so they stay inside the fused time loop (no HBM round-trips).
        for l in range(1, num_layers):
            pre = (
                jnp.dot(layer_in.astype(compute_dtype), wih_refs[l][...],
                        preferred_element_type=jnp.float32)
                + jnp.dot(h_ref[l].astype(compute_dtype), whh_refs[l][...],
                          preferred_element_type=jnp.float32)
                + bias_refs[l][...]
            )
            h_new = act(pre)
            h_ref[l] = h_new
            layer_in = h_new
        out_ref[i] = layer_in.astype(out_ref.dtype)
        return carry

    jax.lax.fori_loop(0, chunk, step, 0, unroll=True)

    @pl.when(c == pl.num_programs(0) - 1)
    def _():
        hn_ref[...] = h_ref[...].astype(hn_ref.dtype)


def rnn_forward(x, params, *, nonlinearity="tanh",
                compute_dtype=jnp.bfloat16, max_chunk=16):
    """Fused multi-layer RNN forward.

    x:      (S, B, I) float32  (time-major, like torch.nn.RNN default)
    params: list of (w_ih (H,in), w_hh (H,H), b_ih (H,), b_hh (H,)) per layer
    returns (output (S,B,H) f32, h_n (L,B,H) f32)
    """
    S, B, I = x.shape
    L = len(params)
    H = params[0][0].shape[0]
    cd = compute_dtype

    # Pad batch to a multiple of 8 (sublane width); padded rows are independent
    # and sliced off at the end.
    B_pad = ((B + 7) // 8) * 8
    x_p = x if B_pad == B else jnp.pad(x, ((0, 0), (0, B_pad - B), (0, 0)))

    # Hoisted input projection for layer 0: one (S*B, I) x (I, H) GEMM with the
    # combined bias folded in.  Matmul in compute_dtype, accumulate/keep f32.
    w_ih0, w_hh0, b_ih0, b_hh0 = params[0]
    bias0 = (b_ih0 + b_hh0).astype(jnp.float32).reshape(1, 1, H)
    gates0 = jnp.dot(x_p.astype(cd), w_ih0.T.astype(cd),
                     preferred_element_type=jnp.float32) + bias0

    # Chunk T timesteps per grid step (largest divisor of S up to max_chunk).
    chunk = 1
    for cand in range(min(S, max_chunk), 0, -1):
        if S % cand == 0:
            chunk = cand
            break

    inputs = [gates0, w_hh0.T.astype(cd)]
    in_specs = [
        pl.BlockSpec((chunk, B_pad, H), lambda c: (c, 0, 0)),   # gates chunk
        pl.BlockSpec((H, H), lambda c: (0, 0)),                 # W_hh_0^T resident
    ]
    for l in range(1, L):
        w_ih, w_hh, b_ih, b_hh = params[l]
        inputs += [
            w_ih.T.astype(cd),
            (b_ih + b_hh).astype(jnp.float32).reshape(1, H),
            w_hh.T.astype(cd),
        ]
        in_specs += [
            pl.BlockSpec((H, H), lambda c: (0, 0)),             # W_ih_l^T resident
            pl.BlockSpec((1, H), lambda c: (0, 0)),             # combined bias_l
            pl.BlockSpec((H, H), lambda c: (0, 0)),             # W_hh_l^T resident
        ]

    kernel = functools.partial(
        _fused_rnn_kernel, num_layers=L, chunk=chunk,
        nonlinearity=nonlinearity, compute_dtype=cd)

    out, h_n = pl.pallas_call(
        kernel,
        out_shape=(
            jax.ShapeDtypeStruct((S, B_pad, H), jnp.float32),
            jax.ShapeDtypeStruct((L, B_pad, H), jnp.float32),
        ),
        grid_spec=pltpu.PrefetchScalarGridSpec(
            num_scalar_prefetch=0,
            grid=(S // chunk,),
            in_specs=in_specs,
            out_specs=(
                pl.BlockSpec((chunk, B_pad, H), lambda c: (c, 0, 0)),
                pl.BlockSpec((L, B_pad, H), lambda c: (0, 0, 0)),
            ),
            scratch_shapes=[pltpu.VMEM((L, B_pad, H), jnp.float32)],  # h carry
        ),
        compiler_params=pltpu.CompilerParams(
            dimension_semantics=("arbitrary",),   # recurrence -> sequential
        ),
    )(*inputs)

    return out[:, :B], h_n[:, :B]


class TransformerPallas:
    """JAX/Pallas equivalent of the (RNN-shaped) reference module."""

    def __init__(self, input_size, hidden_size, num_layers, nonlinearity="tanh",
                 key=None, compute_dtype=jnp.bfloat16):
        assert nonlinearity in ("tanh", "relu")
        if key is None:
            key = jax.random.PRNGKey(0)
        self.input_size = input_size
        self.hidden_size = hidden_size
        self.num_layers = num_layers
        self.nonlinearity = nonlinearity
        self.compute_dtype = compute_dtype

        # Deterministic init, matching torch.nn.RNN's U(-1/sqrt(H), 1/sqrt(H)).
        bound = 1.0 / (hidden_size ** 0.5)
        self.params = []
        for layer in range(num_layers):
            in_sz = input_size if layer == 0 else hidden_size
            key, k1, k2, k3, k4 = jax.random.split(key, 5)
            w_ih = jax.random.uniform(k1, (hidden_size, in_sz), jnp.float32,
                                      -bound, bound)
            w_hh = jax.random.uniform(k2, (hidden_size, hidden_size), jnp.float32,
                                      -bound, bound)
            b_ih = jax.random.uniform(k3, (hidden_size,), jnp.float32, -bound, bound)
            b_hh = jax.random.uniform(k4, (hidden_size,), jnp.float32, -bound, bound)
            self.params.append((w_ih, w_hh, b_ih, b_hh))

    def __call__(self, x):
        return rnn_forward(x, self.params, nonlinearity=self.nonlinearity,
                           compute_dtype=self.compute_dtype)


def _reference_rnn(x, params, nonlinearity):
    """Pure-JAX f32 reference for correctness checking."""
    out = x
    for (w_ih, w_hh, b_ih, b_hh) in params:
        S, B, _ = out.shape
        H = w_ih.shape[0]
        h = jnp.zeros((B, H), jnp.float32)
        ys = []
        for t in range(S):
            pre = out[t] @ w_ih.T + b_ih + h @ w_hh.T + b_hh
            h = jnp.tanh(pre) if nonlinearity == "tanh" else jnp.maximum(pre, 0.0)
            ys.append(h)
        out = jnp.stack(ys, axis=0)
    return out


if __name__ == "__main__":
    # Small shapes consistent with the module's (input_size, hidden_size,
    # num_layers) constructor: seq=8, batch=2, input=32, hidden=32, layers=2.
    seq, batch, input_size, hidden_size, num_layers = 8, 2, 32, 32, 2

    key = jax.random.PRNGKey(0)
    key, xk, mk = jax.random.split(key, 3)
    x = jax.random.normal(xk, (seq, batch, input_size), dtype=jnp.float32)

    model = TransformerPallas(input_size, hidden_size, num_layers,
                              nonlinearity="tanh", key=mk)
    ref = _reference_rnn(x, model.params, model.nonlinearity)

    # f32 path: exact check.
    out_f32, hn_f32 = rnn_forward(x, model.params,
                                  nonlinearity=model.nonlinearity,
                                  compute_dtype=jnp.float32)
    out_f32 = jax.block_until_ready(out_f32)
    hn_f32 = jax.block_until_ready(hn_f32)
    assert out_f32.shape == (seq, batch, hidden_size)
    assert hn_f32.shape == (num_layers, batch, hidden_size)
    assert jnp.allclose(out_f32, ref, atol=1e-4, rtol=1e-4)
    assert jnp.allclose(hn_f32[-1], ref[-1], atol=1e-4, rtol=1e-4)

    # bf16-matmul path (default, 2x MXU throughput): loose check vs f32 ref.
    out_bf16, hn_bf16 = model(x)
    out_bf16 = jax.block_until_ready(out_bf16)
    hn_bf16 = jax.block_until_ready(hn_bf16)
    assert jnp.allclose(out_bf16, ref, atol=5e-2)
    assert jnp.allclose(hn_bf16[-1], ref[-1], atol=5e-2)

    print("KERNEL_OK")
</pallas_src>

<mosaic_0001>
module attributes {stable_mosaic.version = 11 : i64} {
  func.func @_fused_rnn_kernel(%arg0: i32, %arg1: memref<8x8x32xf32, #tpu.memory_space<vmem>>, %arg2: memref<32x32xf32, #tpu.memory_space<vmem>>, %arg3: memref<32x32xf32, #tpu.memory_space<vmem>>, %arg4: memref<1x32xf32, #tpu.memory_space<vmem>>, %arg5: memref<32x32xf32, #tpu.memory_space<vmem>>, %arg6: memref<8x8x32xf32, #tpu.memory_space<vmem>>, %arg7: memref<2x8x32xf32, #tpu.memory_space<vmem>>, %arg8: memref<2x8x32xf32, #tpu.memory_space<vmem>>) attributes {dimension_semantics = [#tpu.dimension_semantics<arbitrary>], iteration_bounds = array<i64: 1>, scalar_prefetch = 0 : i64, scratch_operands = 1 : i64, tpu.core_type = #tpu.core_type<tc>, window_params = [{transform_indices = @transform_0, window_bounds = array<i64: 8, 8, 32>}, {pipeline_mode = #tpu.pipeline_mode<synchronous>, transform_indices = @transform_1, window_bounds = array<i64: 32, 32>}, {pipeline_mode = #tpu.pipeline_mode<synchronous>, transform_indices = @transform_2, window_bounds = array<i64: 32, 32>}, {pipeline_mode = #tpu.pipeline_mode<synchronous>, transform_indices = @transform_3, window_bounds = array<i64: 1, 32>}, {pipeline_mode = #tpu.pipeline_mode<synchronous>, transform_indices = @transform_4, window_bounds = array<i64: 32, 32>}, {transform_indices = @transform_5, window_bounds = array<i64: 8, 8, 32>}, {pipeline_mode = #tpu.pipeline_mode<synchronous>, transform_indices = @transform_6, window_bounds = array<i64: 2, 8, 32>}]} {
    %c0_i32 = arith.constant 0 : i32
    %0 = arith.cmpi eq, %arg0, %c0_i32 : i32
    %1 = arith.extui %0 : i1 to i32
    %c0_i32_0 = arith.constant 0 : i32
    %2 = arith.cmpi ne, %1, %c0_i32_0 : i32
    scf.if %2 {
      %cst_217 = arith.constant 0.000000e+00 : f32
      %246 = vector.broadcast %cst_217 : f32 to vector<2x8x32xf32>
      %c0_218 = arith.constant 0 : index
      %c0_219 = arith.constant 0 : index
      %c0_220 = arith.constant 0 : index
      %247 = vector.load %arg8[%c0_218, %c0_219, %c0_220] : memref<2x8x32xf32, #tpu.memory_space<vmem>>, vector<2x8x32xf32>
      tpu.vector_store %arg8[%c0_218, %c0_219, %c0_220], %246 {strides = array<i32>} : memref<2x8x32xf32, #tpu.memory_space<vmem>>, vector<2x8x32xf32>,
    } else {
    }
    %c0_i32_1 = arith.constant 0 : i32
    %3 = arith.index_cast %c0_i32_1 : i32 to index
    %c0 = arith.constant 0 : index
    %c0_2 = arith.constant 0 : index
    %4 = vector.load %arg1[%3, %c0, %c0_2] : memref<8x8x32xf32, #tpu.memory_space<vmem>>, vector<1x8x32xf32>
    %5 = vector.shape_cast %4 : vector<1x8x32xf32> to vector<8x32xf32>
    %c0_3 = arith.constant 0 : index
    %c0_4 = arith.constant 0 : index
    %c0_5 = arith.constant 0 : index
    %6 = vector.load %arg8[%c0_3, %c0_4, %c0_5] : memref<2x8x32xf32, #tpu.memory_space<vmem>>, vector<1x8x32xf32>
    %7 = vector.shape_cast %6 : vector<1x8x32xf32> to vector<8x32xf32>
    %c0_6 = arith.constant 0 : index
    %c0_7 = arith.constant 0 : index
    %8 = vector.load %arg2[%c0_6, %c0_7] : memref<32x32xf32, #tpu.memory_space<vmem>>, vector<32x32xf32>
    %cst = arith.constant dense<0.000000e+00> : vector<8x32xf32>
    %9 = tpu.matmul %7, %8, %cst {dimension_numbers = #tpu.dot_dimension_numbers<[1], [0], [0], [1], [0, 0, 1, 1], [], []>} : vector<8x32xf32>, vector<32x32xf32>, vector<8x32xf32> -> vector<8x32xf32>
    %10 = arith.addf %5, %9 : vector<8x32xf32>
    %11 = math.tanh %10 : vector<8x32xf32>
    %c0_8 = arith.constant 0 : index
    %c0_9 = arith.constant 0 : index
    %c0_10 = arith.constant 0 : index
    %12 = vector.load %arg8[%c0_8, %c0_9, %c0_10] : memref<2x8x32xf32, #tpu.memory_space<vmem>>, vector<1x8x32xf32>
    %13 = vector.shape_cast %12 : vector<1x8x32xf32> to vector<8x32xf32>
    %14 = vector.shape_cast %11 : vector<8x32xf32> to vector<1x8x32xf32>
    tpu.vector_store %arg8[%c0_8, %c0_9, %c0_10], %14 {strides = array<i32>} : memref<2x8x32xf32, #tpu.memory_space<vmem>>, vector<1x8x32xf32>,
    %c0_11 = arith.constant 0 : index
    %c0_12 = arith.constant 0 : index
    %15 = vector.load %arg3[%c0_11, %c0_12] : memref<32x32xf32, #tpu.memory_space<vmem>>, vector<32x32xf32>
    %cst_13 = arith.constant dense<0.000000e+00> : vector<8x32xf32>
    %16 = tpu.matmul %11, %15, %cst_13 {dimension_numbers = #tpu.dot_dimension_numbers<[1], [0], [0], [1], [0, 0, 1, 1], [], []>} : vector<8x32xf32>, vector<32x32xf32>, vector<8x32xf32> -> vector<8x32xf32>
    %c1 = arith.constant 1 : index
    %c0_14 = arith.constant 0 : index
    %c0_15 = arith.constant 0 : index
    %17 = vector.load %arg8[%c1, %c0_14, %c0_15] : memref<2x8x32xf32, #tpu.memory_space<vmem>>, vector<1x8x32xf32>
    %18 = vector.shape_cast %17 : vector<1x8x32xf32> to vector<8x32xf32>
    %c0_16 = arith.constant 0 : index
    %c0_17 = arith.constant 0 : index
    %19 = vector.load %arg5[%c0_16, %c0_17] : memref<32x32xf32, #tpu.memory_space<vmem>>, vector<32x32xf32>
    %cst_18 = arith.constant dense<0.000000e+00> : vector<8x32xf32>
    %20 = tpu.matmul %18, %19, %cst_18 {dimension_numbers = #tpu.dot_dimension_numbers<[1], [0], [0], [1], [0, 0, 1, 1], [], []>} : vector<8x32xf32>, vector<32x32xf32>, vector<8x32xf32> -> vector<8x32xf32>
    %21 = arith.addf %16, %20 : vector<8x32xf32>
    %c0_19 = arith.constant 0 : index
    %c0_20 = arith.constant 0 : index
    %22 = vector.load %arg4[%c0_19, %c0_20] : memref<1x32xf32, #tpu.memory_space<vmem>>, vector<1x32xf32>
    %23 = vector.broadcast %22 : vector<1x32xf32> to vector<8x32xf32>
    %24 = arith.addf %21, %23 : vector<8x32xf32>
    %25 = math.tanh %24 : vector<8x32xf32>
    %c1_21 = arith.constant 1 : index
    %c0_22 = arith.constant 0 : index
    %c0_23 = arith.constant 0 : index
    %26 = vector.load %arg8[%c1_21, %c0_22, %c0_23] : memref<2x8x32xf32, #tpu.memory_space<vmem>>, vector<1x8x32xf32>
    %27 = vector.shape_cast %26 : vector<1x8x32xf32> to vector<8x32xf32>
    %28 = vector.shape_cast %25 : vector<8x32xf32> to vector<1x8x32xf32>
    tpu.vector_store %arg8[%c1_21, %c0_22, %c0_23], %28 {strides = array<i32>} : memref<2x8x32xf32, #tpu.memory_space<vmem>>, vector<1x8x32xf32>,
    %29 = arith.index_cast %c0_i32_1 : i32 to index
    %c0_24 = arith.constant 0 : index
    %c0_25 = arith.constant 0 : index
    %30 = vector.load %arg6[%29, %c0_24, %c0_25] : memref<8x8x32xf32, #tpu.memory_space<vmem>>, vector<1x8x32xf32>
    %31 = vector.shape_cast %30 : vector<1x8x32xf32> to vector<8x32xf32>
    %32 = vector.shape_cast %25 : vector<8x32xf32> to vector<1x8x32xf32>
    tpu.vector_store %arg6[%29, %c0_24, %c0_25], %32 {strides = array<i32>} : memref<8x8x32xf32, #tpu.memory_space<vmem>>, vector<1x8x32xf32>,
    %c1_i32 = arith.constant 1 : i32
    %33 = arith.index_cast %c1_i32 : i32 to index
    %c0_26 = arith.constant 0 : index
    %c0_27 = arith.constant 0 : index
    %34 = vector.load %arg1[%33, %c0_26, %c0_27] : memref<8x8x32xf32, #tpu.memory_space<vmem>>, vector<1x8x32xf32>
    %35 = vector.shape_cast %34 : vector<1x8x32xf32> to vector<8x32xf32>
    %c0_28 = arith.constant 0 : index
    %c0_29 = arith.constant 0 : index
    %c0_30 = arith.constant 0 : index
    %36 = vector.load %arg8[%c0_28, %c0_29, %c0_30] : memref<2x8x32xf32, #tpu.memory_space<vmem>>, vector<1x8x32xf32>
    %37 = vector.shape_cast %36 : vector<1x8x32xf32> to vector<8x32xf32>
    %c0_31 = arith.constant 0 : index
    %c0_32 = arith.constant 0 : index
    %38 = vector.load %arg2[%c0_31, %c0_32] : memref<32x32xf32, #tpu.memory_space<vmem>>, vector<32x32xf32>
    %cst_33 = arith.constant dense<0.000000e+00> : vector<8x32xf32>
    %39 = tpu.matmul %37, %38, %cst_33 {dimension_numbers = #tpu.dot_dimension_numbers<[1], [0], [0], [1], [0, 0, 1, 1], [], []>} : vector<8x32xf32>, vector<32x32xf32>, vector<8x32xf32> -> vector<8x32xf32>
    %40 = arith.addf %35, %39 : vector<8x32xf32>
    %41 = math.tanh %40 : vector<8x32xf32>
    %c0_34 = arith.constant 0 : index
    %c0_35 = arith.constant 0 : index
    %c0_36 = arith.constant 0 : index
    %42 = vector.load %arg8[%c0_34, %c0_35, %c0_36] : memref<2x8x32xf32, #tpu.memory_space<vmem>>, vector<1x8x32xf32>
    %43 = vector.shape_cast %42 : vector<1x8x32xf32> to vector<8x32xf32>
    %44 = vector.shape_cast %41 : vector<8x32xf32> to vector<1x8x32xf32>
    tpu.vector_store %arg8[%c0_34, %c0_35, %c0_36], %44 {strides = array<i32>} : memref<2x8x32xf32, #tpu.memory_space<vmem>>, vector<1x8x32xf32>,
    %c0_37 = arith.constant 0 : index
    %c0_38 = arith.constant 0 : index
    %45 = vector.load %arg3[%c0_37, %c0_38] : memref<32x32xf32, #tpu.memory_space<vmem>>, vector<32x32xf32>
    %cst_39 = arith.constant dense<0.000000e+00> : vector<8x32xf32>
    %46 = tpu.matmul %41, %45, %cst_39 {dimension_numbers = #tpu.dot_dimension_numbers<[1], [0], [0], [1], [0, 0, 1, 1], [], []>} : vector<8x32xf32>, vector<32x32xf32>, vector<8x32xf32> -> vector<8x32xf32>
    %c1_40 = arith.constant 1 : index
    %c0_41 = arith.constant 0 : index
    %c0_42 = arith.constant 0 : index
    %47 = vector.load %arg8[%c1_40, %c0_41, %c0_42] : memref<2x8x32xf32, #tpu.memory_space<vmem>>, vector<1x8x32xf32>
    %48 = vector.shape_cast %47 : vector<1x8x32xf32> to vector<8x32xf32>
    %c0_43 = arith.constant 0 : index
    %c0_44 = arith.constant 0 : index
    %49 = vector.load %arg5[%c0_43, %c0_44] : memref<32x32xf32, #tpu.memory_space<vmem>>, vector<32x32xf32>
    %cst_45 = arith.constant dense<0.000000e+00> : vector<8x32xf32>
    %50 = tpu.matmul %48, %49, %cst_45 {dimension_numbers = #tpu.dot_dimension_numbers<[1], [0], [0], [1], [0, 0, 1, 1], [], []>} : vector<8x32xf32>, vector<32x32xf32>, vector<8x32xf32> -> vector<8x32xf32>
    %51 = arith.addf %46, %50 : vector<8x32xf32>
    %c0_46 = arith.constant 0 : index
    %c0_47 = arith.constant 0 : index
    %52 = vector.load %arg4[%c0_46, %c0_47] : memref<1x32xf32, #tpu.memory_space<vmem>>, vector<1x32xf32>
    %53 = vector.broadcast %52 : vector<1x32xf32> to vector<8x32xf32>
    %54 = arith.addf %51, %53 : vector<8x32xf32>
    %55 = math.tanh %54 : vector<8x32xf32>
    %c1_48 = arith.constant 1 : index
    %c0_49 = arith.constant 0 : index
    %c0_50 = arith.constant 0 : index
    %56 = vector.load %arg8[%c1_48, %c0_49, %c0_50] : memref<2x8x32xf32, #tpu.memory_space<vmem>>, vector<1x8x32xf32>
    %57 = vector.shape_cast %56 : vector<1x8x32xf32> to vector<8x32xf32>
    %58 = vector.shape_cast %55 : vector<8x32xf32> to vector<1x8x32xf32>
    tpu.vector_store %arg8[%c1_48, %c0_49, %c0_50], %58 {strides = array<i32>} : memref<2x8x32xf32, #tpu.memory_space<vmem>>, vector<1x8x32xf32>,
    %59 = arith.index_cast %c1_i32 : i32 to index
    %c0_51 = arith.constant 0 : index
    %c0_52 = arith.constant 0 : index
    %60 = vector.load %arg6[%59, %c0_51, %c0_52] : memref<8x8x32xf32, #tpu.memory_space<vmem>>, vector<1x8x32xf32>
    %61 = vector.shape_cast %60 : vector<1x8x32xf32> to vector<8x32xf32>
    %62 = vector.shape_cast %55 : vector<8x32xf32> to vector<1x8x32xf32>
    tpu.vector_store %arg6[%59, %c0_51, %c0_52], %62 {strides = array<i32>} : memref<8x8x32xf32, #tpu.memory_space<vmem>>, vector<1x8x32xf32>,
    %c2_i32 = arith.constant 2 : i32
    %63 = arith.index_cast %c2_i32 : i32 to index
    %c0_53 = arith.constant 0 : index
    %c0_54 = arith.constant 0 : index
    %64 = vector.load %arg1[%63, %c0_53, %c0_54] : memref<8x8x32xf32, #tpu.memory_space<vmem>>, vector<1x8x32xf32>
    %65 = vector.shape_cast %64 : vector<1x8x32xf32> to vector<8x32xf32>
    %c0_55 = arith.constant 0 : index
    %c0_56 = arith.constant 0 : index
    %c0_57 = arith.constant 0 : index
    %66 = vector.load %arg8[%c0_55, %c0_56, %c0_57] : memref<2x8x32xf32, #tpu.memory_space<vmem>>, vector<1x8x32xf32>
    %67 = vector.shape_cast %66 : vector<1x8x32xf32> to vector<8x32xf32>
    %c0_58 = arith.constant 0 : index
    %c0_59 = arith.constant 0 : index
    %68 = vector.load %arg2[%c0_58, %c0_59] : memref<32x32xf32, #tpu.memory_space<vmem>>, vector<32x32xf32>
    %cst_60 = arith.constant dense<0.000000e+00> : vector<8x32xf32>
    %69 = tpu.matmul %67, %68, %cst_60 {dimension_numbers = #tpu.dot_dimension_numbers<[1], [0], [0], [1], [0, 0, 1, 1], [], []>} : vector<8x32xf32>, vector<32x32xf32>, vector<8x32xf32> -> vector<8x32xf32>
    %70 = arith.addf %65, %69 : vector<8x32xf32>
    %71 = math.tanh %70 : vector<8x32xf32>
    %c0_61 = arith.constant 0 : index
    %c0_62 = arith.constant 0 : index
    %c0_63 = arith.constant 0 : index
    %72 = vector.load %arg8[%c0_61, %c0_62, %c0_63] : memref<2x8x32xf32, #tpu.memory_space<vmem>>, vector<1x8x32xf32>
    %73 = vector.shape_cast %72 : vector<1x8x32xf32> to vector<8x32xf32>
    %74 = vector.shape_cast %71 : vector<8x32xf32> to vector<1x8x32xf32>
    tpu.vector_store %arg8[%c0_61, %c0_62, %c0_63], %74 {strides = array<i32>} : memref<2x8x32xf32, #tpu.memory_space<vmem>>, vector<1x8x32xf32>,
    %c0_64 = arith.constant 0 : index
    %c0_65 = arith.constant 0 : index
    %75 = vector.load %arg3[%c0_64, %c0_65] : memref<32x32xf32, #tpu.memory_space<vmem>>, vector<32x32xf32>
    %cst_66 = arith.constant dense<0.000000e+00> : vector<8x32xf32>
    %76 = tpu.matmul %71, %75, %cst_66 {dimension_numbers = #tpu.dot_dimension_numbers<[1], [0], [0], [1], [0, 0, 1, 1], [], []>} : vector<8x32xf32>, vector<32x32xf32>, vector<8x32xf32> -> vector<8x32xf32>
    %c1_67 = arith.constant 1 : index
    %c0_68 = arith.constant 0 : index
    %c0_69 = arith.constant 0 : index
    %77 = vector.load %arg8[%c1_67, %c0_68, %c0_69] : memref<2x8x32xf32, #tpu.memory_space<vmem>>, vector<1x8x32xf32>
    %78 = vector.shape_cast %77 : vector<1x8x32xf32> to vector<8x32xf32>
    %c0_70 = arith.constant 0 : index
    %c0_71 = arith.constant 0 : index
    %79 = vector.load %arg5[%c0_70, %c0_71] : memref<32x32xf32, #tpu.memory_space<vmem>>, vector<32x32xf32>
    %cst_72 = arith.constant dense<0.000000e+00> : vector<8x32xf32>
    %80 = tpu.matmul %78, %79, %cst_72 {dimension_numbers = #tpu.dot_dimension_numbers<[1], [0], [0], [1], [0, 0, 1, 1], [], []>} : vector<8x32xf32>, vector<32x32xf32>, vector<8x32xf32> -> vector<8x32xf32>
    %81 = arith.addf %76, %80 : vector<8x32xf32>
    %c0_73 = arith.constant 0 : index
    %c0_74 = arith.constant 0 : index
    %82 = vector.load %arg4[%c0_73, %c0_74] : memref<1x32xf32, #tpu.memory_space<vmem>>, vector<1x32xf32>
    %83 = vector.broadcast %82 : vector<1x32xf32> to vector<8x32xf32>
    %84 = arith.addf %81, %83 : vector<8x32xf32>
    %85 = math.tanh %84 : vector<8x32xf32>
    %c1_75 = arith.constant 1 : index
    %c0_76 = arith.constant 0 : index
    %c0_77 = arith.constant 0 : index
    %86 = vector.load %arg8[%c1_75, %c0_76, %c0_77] : memref<2x8x32xf32, #tpu.memory_space<vmem>>, vector<1x8x32xf32>
    %87 = vector.shape_cast %86 : vector<1x8x32xf32> to vector<8x32xf32>
    %88 = vector.shape_cast %85 : vector<8x32xf32> to vector<1x8x32xf32>
    tpu.vector_store %arg8[%c1_75, %c0_76, %c0_77], %88 {strides = array<i32>} : memref<2x8x32xf32, #tpu.memory_space<vmem>>, vector<1x8x32xf32>,
    %89 = arith.index_cast %c2_i32 : i32 to index
    %c0_78 = arith.constant 0 : index
    %c0_79 = arith.constant 0 : index
    %90 = vector.load %arg6[%89, %c0_78, %c0_79] : memref<8x8x32xf32, #tpu.memory_space<vmem>>, vector<1x8x32xf32>
    %91 = vector.shape_cast %90 : vector<1x8x32xf32> to vector<8x32xf32>
    %92 = vector.shape_cast %85 : vector<8x32xf32> to vector<1x8x32xf32>
    tpu.vector_store %arg6[%89, %c0_78, %c0_79], %92 {strides = array<i32>} : memref<8x8x32xf32, #tpu.memory_space<vmem>>, vector<1x8x32xf32>,
    %c3_i32 = arith.constant 3 : i32
    %93 = arith.index_cast %c3_i32 : i32 to index
    %c0_80 = arith.constant 0 : index
    %c0_81 = arith.constant 0 : index
    %94 = vector.load %arg1[%93, %c0_80, %c0_81] : memref<8x8x32xf32, #tpu.memory_space<vmem>>, vector<1x8x32xf32>
    %95 = vector.shape_cast %94 : vector<1x8x32xf32> to vector<8x32xf32>
    %c0_82 = arith.constant 0 : index
    %c0_83 = arith.constant 0 : index
    %c0_84 = arith.constant 0 : index
    %96 = vector.load %arg8[%c0_82, %c0_83, %c0_84] : memref<2x8x32xf32, #tpu.memory_space<vmem>>, vector<1x8x32xf32>
    %97 = vector.shape_cast %96 : vector<1x8x32xf32> to vector<8x32xf32>
    %c0_85 = arith.constant 0 : index
    %c0_86 = arith.constant 0 : index
    %98 = vector.load %arg2[%c0_85, %c0_86] : memref<32x32xf32, #tpu.memory_space<vmem>>, vector<32x32xf32>
    %cst_87 = arith.constant dense<0.000000e+00> : vector<8x32xf32>
    %99 = tpu.matmul %97, %98, %cst_87 {dimension_numbers = #tpu.dot_dimension_numbers<[1], [0], [0], [1], [0, 0, 1, 1], [], []>} : vector<8x32xf32>, vector<32x32xf32>, vector<8x32xf32> -> vector<8x32xf32>
    %100 = arith.addf %95, %99 : vector<8x32xf32>
    %101 = math.tanh %100 : vector<8x32xf32>
    %c0_88 = arith.constant 0 : index
    %c0_89 = arith.constant 0 : index
    %c0_90 = arith.constant 0 : index
    %102 = vector.load %arg8[%c0_88, %c0_89, %c0_90] : memref<2x8x32xf32, #tpu.memory_space<vmem>>, vector<1x8x32xf32>
    %103 = vector.shape_cast %102 : vector<1x8x32xf32> to vector<8x32xf32>
    %104 = vector.shape_cast %101 : vector<8x32xf32> to vector<1x8x32xf32>
    tpu.vector_store %arg8[%c0_88, %c0_89, %c0_90], %104 {strides = array<i32>} : memref<2x8x32xf32, #tpu.memory_space<vmem>>, vector<1x8x32xf32>,
    %c0_91 = arith.constant 0 : index
    %c0_92 = arith.constant 0 : index
    %105 = vector.load %arg3[%c0_91, %c0_92] : memref<32x32xf32, #tpu.memory_space<vmem>>, vector<32x32xf32>
    %cst_93 = arith.constant dense<0.000000e+00> : vector<8x32xf32>
    %106 = tpu.matmul %101, %105, %cst_93 {dimension_numbers = #tpu.dot_dimension_numbers<[1], [0], [0], [1], [0, 0, 1, 1], [], []>} : vector<8x32xf32>, vector<32x32xf32>, vector<8x32xf32> -> vector<8x32xf32>
    %c1_94 = arith.constant 1 : index
    %c0_95 = arith.constant 0 : index
    %c0_96 = arith.constant 0 : index
    %107 = vector.load %arg8[%c1_94, %c0_95, %c0_96] : memref<2x8x32xf32, #tpu.memory_space<vmem>>, vector<1x8x32xf32>
    %108 = vector.shape_cast %107 : vector<1x8x32xf32> to vector<8x32xf32>
    %c0_97 = arith.constant 0 : index
    %c0_98 = arith.constant 0 : index
    %109 = vector.load %arg5[%c0_97, %c0_98] : memref<32x32xf32, #tpu.memory_space<vmem>>, vector<32x32xf32>
    %cst_99 = arith.constant dense<0.000000e+00> : vector<8x32xf32>
    %110 = tpu.matmul %108, %109, %cst_99 {dimension_numbers = #tpu.dot_dimension_numbers<[1], [0], [0], [1], [0, 0, 1, 1], [], []>} : vector<8x32xf32>, vector<32x32xf32>, vector<8x32xf32> -> vector<8x32xf32>
    %111 = arith.addf %106, %110 : vector<8x32xf32>
    %c0_100 = arith.constant 0 : index
    %c0_101 = arith.constant 0 : index
    %112 = vector.load %arg4[%c0_100, %c0_101] : memref<1x32xf32, #tpu.memory_space<vmem>>, vector<1x32xf32>
    %113 = vector.broadcast %112 : vector<1x32xf32> to vector<8x32xf32>
    %114 = arith.addf %111, %113 : vector<8x32xf32>
    %115 = math.tanh %114 : vector<8x32xf32>
    %c1_102 = arith.constant 1 : index
    %c0_103 = arith.constant 0 : index
    %c0_104 = arith.constant 0 : index
    %116 = vector.load %arg8[%c1_102, %c0_103, %c0_104] : memref<2x8x32xf32, #tpu.memory_space<vmem>>, vector<1x8x32xf32>
    %117 = vector.shape_cast %116 : vector<1x8x32xf32> to vector<8x32xf32>
    %118 = vector.shape_cast %115 : vector<8x32xf32> to vector<1x8x32xf32>
    tpu.vector_store %arg8[%c1_102, %c0_103, %c0_104], %118 {strides = array<i32>} : memref<2x8x32xf32, #tpu.memory_space<vmem>>, vector<1x8x32xf32>,
    %119 = arith.index_cast %c3_i32 : i32 to index
    %c0_105 = arith.constant 0 : index
    %c0_106 = arith.constant 0 : index
    %120 = vector.load %arg6[%119, %c0_105, %c0_106] : memref<8x8x32xf32, #tpu.memory_space<vmem>>, vector<1x8x32xf32>
    %121 = vector.shape_cast %120 : vector<1x8x32xf32> to vector<8x32xf32>
    %122 = vector.shape_cast %115 : vector<8x32xf32> to vector<1x8x32xf32>
    tpu.vector_store %arg6[%119, %c0_105, %c0_106], %122 {strides = array<i32>} : memref<8x8x32xf32, #tpu.memory_space<vmem>>, vector<1x8x32xf32>,
    %c4_i32 = arith.constant 4 : i32
    %123 = arith.index_cast %c4_i32 : i32 to index
    %c0_107 = arith.constant 0 : index
    %c0_108 = arith.constant 0 : index
    %124 = vector.load %arg1[%123, %c0_107, %c0_108] : memref<8x8x32xf32, #tpu.memory_space<vmem>>, vector<1x8x32xf32>
    %125 = vector.shape_cast %124 : vector<1x8x32xf32> to vector<8x32xf32>
    %c0_109 = arith.constant 0 : index
    %c0_110 = arith.constant 0 : index
    %c0_111 = arith.constant 0 : index
    %126 = vector.load %arg8[%c0_109, %c0_110, %c0_111] : memref<2x8x32xf32, #tpu.memory_space<vmem>>, vector<1x8x32xf32>
    %127 = vector.shape_cast %126 : vector<1x8x32xf32> to vector<8x32xf32>
    %c0_112 = arith.constant 0 : index
    %c0_113 = arith.constant 0 : index
    %128 = vector.load %arg2[%c0_112, %c0_113] : memref<32x32xf32, #tpu.memory_space<vmem>>, vector<32x32xf32>
    %cst_114 = arith.constant dense<0.000000e+00> : vector<8x32xf32>
    %129 = tpu.matmul %127, %128, %cst_114 {dimension_numbers = #tpu.dot_dimension_numbers<[1], [0], [0], [1], [0, 0, 1, 1], [], []>} : vector<8x32xf32>, vector<32x32xf32>, vector<8x32xf32> -> vector<8x32xf32>
    %130 = arith.addf %125, %129 : vector<8x32xf32>
    %131 = math.tanh %130 : vector<8x32xf32>
    %c0_115 = arith.constant 0 : index
    %c0_116 = arith.constant 0 : index
    %c0_117 = arith.constant 0 : index
    %132 = vector.load %arg8[%c0_115, %c0_116, %c0_117] : memref<2x8x32xf32, #tpu.memory_space<vmem>>, vector<1x8x32xf32>
    %133 = vector.shape_cast %132 : vector<1x8x32xf32> to vector<8x32xf32>
    %134 = vector.shape_cast %131 : vector<8x32xf32> to vector<1x8x32xf32>
    tpu.vector_store %arg8[%c0_115, %c0_116, %c0_117], %134 {strides = array<i32>} : memref<2x8x32xf32, #tpu.memory_space<vmem>>, vector<1x8x32xf32>,
    %c0_118 = arith.constant 0 : index
    %c0_119 = arith.constant 0 : index
    %135 = vector.load %arg3[%c0_118, %c0_119] : memref<32x32xf32, #tpu.memory_space<vmem>>, vector<32x32xf32>
    %cst_120 = arith.constant dense<0.000000e+00> : vector<8x32xf32>
    %136 = tpu.matmul %131, %135, %cst_120 {dimension_numbers = #tpu.dot_dimension_numbers<[1], [0], [0], [1], [0, 0, 1, 1], [], []>} : vector<8x32xf32>, vector<32x32xf32>, vector<8x32xf32> -> vector<8x32xf32>
    %c1_121 = arith.constant 1 : index
    %c0_122 = arith.constant 0 : index
    %c0_123 = arith.constant 0 : index
    %137 = vector.load %arg8[%c1_121, %c0_122, %c0_123] : memref<2x8x32xf32, #tpu.memory_space<vmem>>, vector<1x8x32xf32>
    %138 = vector.shape_cast %137 : vector<1x8x32xf32> to vector<8x32xf32>
    %c0_124 = arith.constant 0 : index
    %c0_125 = arith.constant 0 : index
    %139 = vector.load %arg5[%c0_124, %c0_125] : memref<32x32xf32, #tpu.memory_space<vmem>>, vector<32x32xf32>
    %cst_126 = arith.constant dense<0.000000e+00> : vector<8x32xf32>
    %140 = tpu.matmul %138, %139, %cst_126 {dimension_numbers = #tpu.dot_dimension_numbers<[1], [0], [0], [1], [0, 0, 1, 1], [], []>} : vector<8x32xf32>, vector<32x32xf32>, vector<8x32xf32> -> vector<8x32xf32>
    %141 = arith.addf %136, %140 : vector<8x32xf32>
    %c0_127 = arith.constant 0 : index
    %c0_128 = arith.constant 0 : index
    %142 = vector.load %arg4[%c0_127, %c0_128] : memref<1x32xf32, #tpu.memory_space<vmem>>, vector<1x32xf32>
    %143 = vector.broadcast %142 : vector<1x32xf32> to vector<8x32xf32>
    %144 = arith.addf %141, %143 : vector<8x32xf32>
    %145 = math.tanh %144 : vector<8x32xf32>
    %c1_129 = arith.constant 1 : index
    %c0_130 = arith.constant 0 : index
    %c0_131 = arith.constant 0 : index
    %146 = vector.load %arg8[%c1_129, %c0_130, %c0_131] : memref<2x8x32xf32, #tpu.memory_space<vmem>>, vector<1x8x32xf32>
    %147 = vector.shape_cast %146 : vector<1x8x32xf32> to vector<8x32xf32>
    %148 = vector.shape_cast %145 : vector<8x32xf32> to vector<1x8x32xf32>
    tpu.vector_store %arg8[%c1_129, %c0_130, %c0_131], %148 {strides = array<i32>} : memref<2x8x32xf32, #tpu.memory_space<vmem>>, vector<1x8x32xf32>,
    %149 = arith.index_cast %c4_i32 : i32 to index
    %c0_132 = arith.constant 0 : index
    %c0_133 = arith.constant 0 : index
    %150 = vector.load %arg6[%149, %c0_132, %c0_133] : memref<8x8x32xf32, #tpu.memory_space<vmem>>, vector<1x8x32xf32>
    %151 = vector.shape_cast %150 : vector<1x8x32xf32> to vector<8x32xf32>
    %152 = vector.shape_cast %145 : vector<8x32xf32> to vector<1x8x32xf32>
    tpu.vector_store %arg6[%149, %c0_132, %c0_133], %152 {strides = array<i32>} : memref<8x8x32xf32, #tpu.memory_space<vmem>>, vector<1x8x32xf32>,
    %c5_i32 = arith.constant 5 : i32
    %153 = arith.index_cast %c5_i32 : i32 to index
    %c0_134 = arith.constant 0 : index
    %c0_135 = arith.constant 0 : index
    %154 = vector.load %arg1[%153, %c0_134, %c0_135] : memref<8x8x32xf32, #tpu.memory_space<vmem>>, vector<1x8x32xf32>
    %155 = vector.shape_cast %154 : vector<1x8x32xf32> to vector<8x32xf32>
    %c0_136 = arith.constant 0 : index
    %c0_137 = arith.constant 0 : index
    %c0_138 = arith.constant 0 : index
    %156 = vector.load %arg8[%c0_136, %c0_137, %c0_138] : memref<2x8x32xf32, #tpu.memory_space<vmem>>, vector<1x8x32xf32>
    %157 = vector.shape_cast %156 : vector<1x8x32xf32> to vector<8x32xf32>
    %c0_139 = arith.constant 0 : index
    %c0_140 = arith.constant 0 : index
    %158 = vector.load %arg2[%c0_139, %c0_140] : memref<32x32xf32, #tpu.memory_space<vmem>>, vector<32x32xf32>
    %cst_141 = arith.constant dense<0.000000e+00> : vector<8x32xf32>
    %159 = tpu.matmul %157, %158, %cst_141 {dimension_numbers = #tpu.dot_dimension_numbers<[1], [0], [0], [1], [0, 0, 1, 1], [], []>} : vector<8x32xf32>, vector<32x32xf32>, vector<8x32xf32> -> vector<8x32xf32>
    %160 = arith.addf %155, %159 : vector<8x32xf32>
    %161 = math.tanh %160 : vector<8x32xf32>
    %c0_142 = arith.constant 0 : index
    %c0_143 = arith.constant 0 : index
    %c0_144 = arith.constant 0 : index
    %162 = vector.load %arg8[%c0_142, %c0_143, %c0_144] : memref<2x8x32xf32, #tpu.memory_space<vmem>>, vector<1x8x32xf32>
    %163 = vector.shape_cast %162 : vector<1x8x32xf32> to vector<8x32xf32>
    %164 = vector.shape_cast %161 : vector<8x32xf32> to vector<1x8x32xf32>
    tpu.vector_store %arg8[%c0_142, %c0_143, %c0_144], %164 {strides = array<i32>} : memref<2x8x32xf32, #tpu.memory_space<vmem>>, vector<1x8x32xf32>,
    %c0_145 = arith.constant 0 : index
    %c0_146 = arith.constant 0 : index
    %165 = vector.load %arg3[%c0_145, %c0_146] : memref<32x32xf32, #tpu.memory_space<vmem>>, vector<32x32xf32>
    %cst_147 = arith.constant dense<0.000000e+00> : vector<8x32xf32>
    %166 = tpu.matmul %161, %165, %cst_147 {dimension_numbers = #tpu.dot_dimension_numbers<[1], [0], [0], [1], [0, 0, 1, 1], [], []>} : vector<8x32xf32>, vector<32x32xf32>, vector<8x32xf32> -> vector<8x32xf32>
    %c1_148 = arith.constant 1 : index
    %c0_149 = arith.constant 0 : index
    %c0_150 = arith.constant 0 : index
    %167 = vector.load %arg8[%c1_148, %c0_149, %c0_150] : memref<2x8x32xf32, #tpu.memory_space<vmem>>, vector<1x8x32xf32>
    %168 = vector.shape_cast %167 : vector<1x8x32xf32> to vector<8x32xf32>
    %c0_151 = arith.constant 0 : index
    %c0_152 = arith.constant 0 : index
    %169 = vector.load %arg5[%c0_151, %c0_152] : memref<32x32xf32, #tpu.memory_space<vmem>>, vector<32x32xf32>
    %cst_153 = arith.constant dense<0.000000e+00> : vector<8x32xf32>
    %170 = tpu.matmul %168, %169, %cst_153 {dimension_numbers = #tpu.dot_dimension_numbers<[1], [0], [0], [1], [0, 0, 1, 1], [], []>} : vector<8x32xf32>, vector<32x32xf32>, vector<8x32xf32> -> vector<8x32xf32>
    %171 = arith.addf %166, %170 : vector<8x32xf32>
    %c0_154 = arith.constant 0 : index
    %c0_155 = arith.constant 0 : index
    %172 = vector.load %arg4[%c0_154, %c0_155] : memref<1x32xf32, #tpu.memory_space<vmem>>, vector<1x32xf32>
    %173 = vector.broadcast %172 : vector<1x32xf32> to vector<8x32xf32>
    %174 = arith.addf %171, %173 : vector<8x32xf32>
    %175 = math.tanh %174 : vector<8x32xf32>
    %c1_156 = arith.constant 1 : index
    %c0_157 = arith.constant 0 : index
    %c0_158 = arith.constant 0 : index
    %176 = vector.load %arg8[%c1_156, %c0_157, %c0_158] : memref<2x8x32xf32, #tpu.memory_space<vmem>>, vector<1x8x32xf32>
    %177 = vector.shape_cast %176 : vector<1x8x32xf32> to vector<8x32xf32>
    %178 = vector.shape_cast %175 : vector<8x32xf32> to vector<1x8x32xf32>
    tpu.vector_store %arg8[%c1_156, %c0_157, %c0_158], %178 {strides = array<i32>} : memref<2x8x32xf32, #tpu.memory_space<vmem>>, vector<1x8x32xf32>,
    %179 = arith.index_cast %c5_i32 : i32 to index
    %c0_159 = arith.constant 0 : index
    %c0_160 = arith.constant 0 : index
    %180 = vector.load %arg6[%179, %c0_159, %c0_160] : memref<8x8x32xf32, #tpu.memory_space<vmem>>, vector<1x8x32xf32>
    %181 = vector.shape_cast %180 : vector<1x8x32xf32> to vector<8x32xf32>
    %182 = vector.shape_cast %175 : vector<8x32xf32> to vector<1x8x32xf32>
    tpu.vector_store %arg6[%179, %c0_159, %c0_160], %182 {strides = array<i32>} : memref<8x8x32xf32, #tpu.memory_space<vmem>>, vector<1x8x32xf32>,
    %c6_i32 = arith.constant 6 : i32
    %183 = arith.index_cast %c6_i32 : i32 to index
    %c0_161 = arith.constant 0 : index
    %c0_162 = arith.constant 0 : index
    %184 = vector.load %arg1[%183, %c0_161, %c0_162] : memref<8x8x32xf32, #tpu.memory_space<vmem>>, vector<1x8x32xf32>
    %185 = vector.shape_cast %184 : vector<1x8x32xf32> to vector<8x32xf32>
    %c0_163 = arith.constant 0 : index
    %c0_164 = arith.constant 0 : index
    %c0_165 = arith.constant 0 : index
    %186 = vector.load %arg8[%c0_163, %c0_164, %c0_165] : memref<2x8x32xf32, #tpu.memory_space<vmem>>, vector<1x8x32xf32>
    %187 = vector.shape_cast %186 : vector<1x8x32xf32> to vector<8x32xf32>
    %c0_166 = arith.constant 0 : index
    %c0_167 = arith.constant 0 : index
    %188 = vector.load %arg2[%c0_166, %c0_167] : memref<32x32xf32, #tpu.memory_space<vmem>>, vector<32x32xf32>
    %cst_168 = arith.constant dense<0.000000e+00> : vector<8x32xf32>
    %189 = tpu.matmul %187, %188, %cst_168 {dimension_numbers = #tpu.dot_dimension_numbers<[1], [0], [0], [1], [0, 0, 1, 1], [], []>} : vector<8x32xf32>, vector<32x32xf32>, vector<8x32xf32> -> vector<8x32xf32>
    %190 = arith.addf %185, %189 : vector<8x32xf32>
    %191 = math.tanh %190 : vector<8x32xf32>
    %c0_169 = arith.constant 0 : index
    %c0_170 = arith.constant 0 : index
    %c0_171 = arith.constant 0 : index
    %192 = vector.load %arg8[%c0_169, %c0_170, %c0_171] : memref<2x8x32xf32, #tpu.memory_space<vmem>>, vector<1x8x32xf32>
    %193 = vector.shape_cast %192 : vector<1x8x32xf32> to vector<8x32xf32>
    %194 = vector.shape_cast %191 : vector<8x32xf32> to vector<1x8x32xf32>
    tpu.vector_store %arg8[%c0_169, %c0_170, %c0_171], %194 {strides = array<i32>} : memref<2x8x32xf32, #tpu.memory_space<vmem>>, vector<1x8x32xf32>,
    %c0_172 = arith.constant 0 : index
    %c0_173 = arith.constant 0 : index
    %195 = vector.load %arg3[%c0_172, %c0_173] : memref<32x32xf32, #tpu.memory_space<vmem>>, vector<32x32xf32>
    %cst_174 = arith.constant dense<0.000000e+00> : vector<8x32xf32>
    %196 = tpu.matmul %191, %195, %cst_174 {dimension_numbers = #tpu.dot_dimension_numbers<[1], [0], [0], [1], [0, 0, 1, 1], [], []>} : vector<8x32xf32>, vector<32x32xf32>, vector<8x32xf32> -> vector<8x32xf32>
    %c1_175 = arith.constant 1 : index
    %c0_176 = arith.constant 0 : index
    %c0_177 = arith.constant 0 : index
    %197 = vector.load %arg8[%c1_175, %c0_176, %c0_177] : memref<2x8x32xf32, #tpu.memory_space<vmem>>, vector<1x8x32xf32>
    %198 = vector.shape_cast %197 : vector<1x8x32xf32> to vector<8x32xf32>
    %c0_178 = arith.constant 0 : index
    %c0_179 = arith.constant 0 : index
    %199 = vector.load %arg5[%c0_178, %c0_179] : memref<32x32xf32, #tpu.memory_space<vmem>>, vector<32x32xf32>
    %cst_180 = arith.constant dense<0.000000e+00> : vector<8x32xf32>
    %200 = tpu.matmul %198, %199, %cst_180 {dimension_numbers = #tpu.dot_dimension_numbers<[1], [0], [0], [1], [0, 0, 1, 1], [], []>} : vector<8x32xf32>, vector<32x32xf32>, vector<8x32xf32> -> vector<8x32xf32>
    %201 = arith.addf %196, %200 : vector<8x32xf32>
    %c0_181 = arith.constant 0 : index
    %c0_182 = arith.constant 0 : index
    %202 = vector.load %arg4[%c0_181, %c0_182] : memref<1x32xf32, #tpu.memory_space<vmem>>, vector<1x32xf32>
    %203 = vector.broadcast %202 : vector<1x32xf32> to vector<8x32xf32>
    %204 = arith.addf %201, %203 : vector<8x32xf32>
    %205 = math.tanh %204 : vector<8x32xf32>
    %c1_183 = arith.constant 1 : index
    %c0_184 = arith.constant 0 : index
    %c0_185 = arith.constant 0 : index
    %206 = vector.load %arg8[%c1_183, %c0_184, %c0_185] : memref<2x8x32xf32, #tpu.memory_space<vmem>>, vector<1x8x32xf32>
    %207 = vector.shape_cast %206 : vector<1x8x32xf32> to vector<8x32xf32>
    %208 = vector.shape_cast %205 : vector<8x32xf32> to vector<1x8x32xf32>
    tpu.vector_store %arg8[%c1_183, %c0_184, %c0_185], %208 {strides = array<i32>} : memref<2x8x32xf32, #tpu.memory_space<vmem>>, vector<1x8x32xf32>,
    %209 = arith.index_cast %c6_i32 : i32 to index
    %c0_186 = arith.constant 0 : index
    %c0_187 = arith.constant 0 : index
    %210 = vector.load %arg6[%209, %c0_186, %c0_187] : memref<8x8x32xf32, #tpu.memory_space<vmem>>, vector<1x8x32xf32>
    %211 = vector.shape_cast %210 : vector<1x8x32xf32> to vector<8x32xf32>
    %212 = vector.shape_cast %205 : vector<8x32xf32> to vector<1x8x32xf32>
    tpu.vector_store %arg6[%209, %c0_186, %c0_187], %212 {strides = array<i32>} : memref<8x8x32xf32, #tpu.memory_space<vmem>>, vector<1x8x32xf32>,
    %c7_i32 = arith.constant 7 : i32
    %213 = arith.index_cast %c7_i32 : i32 to index
    %c0_188 = arith.constant 0 : index
    %c0_189 = arith.constant 0 : index
    %214 = vector.load %arg1[%213, %c0_188, %c0_189] : memref<8x8x32xf32, #tpu.memory_space<vmem>>, vector<1x8x32xf32>
    %215 = vector.shape_cast %214 : vector<1x8x32xf32> to vector<8x32xf32>
    %c0_190 = arith.constant 0 : index
    %c0_191 = arith.constant 0 : index
    %c0_192 = arith.constant 0 : index
    %216 = vector.load %arg8[%c0_190, %c0_191, %c0_192] : memref<2x8x32xf32, #tpu.memory_space<vmem>>, vector<1x8x32xf32>
    %217 = vector.shape_cast %216 : vector<1x8x32xf32> to vector<8x32xf32>
    %c0_193 = arith.constant 0 : index
    %c0_194 = arith.constant 0 : index
    %218 = vector.load %arg2[%c0_193, %c0_194] : memref<32x32xf32, #tpu.memory_space<vmem>>, vector<32x32xf32>
    %cst_195 = arith.constant dense<0.000000e+00> : vector<8x32xf32>
    %219 = tpu.matmul %217, %218, %cst_195 {dimension_numbers = #tpu.dot_dimension_numbers<[1], [0], [0], [1], [0, 0, 1, 1], [], []>} : vector<8x32xf32>, vector<32x32xf32>, vector<8x32xf32> -> vector<8x32xf32>
    %220 = arith.addf %215, %219 : vector<8x32xf32>
    %221 = math.tanh %220 : vector<8x32xf32>
    %c0_196 = arith.constant 0 : index
    %c0_197 = arith.constant 0 : index
    %c0_198 = arith.constant 0 : index
    %222 = vector.load %arg8[%c0_196, %c0_197, %c0_198] : memref<2x8x32xf32, #tpu.memory_space<vmem>>, vector<1x8x32xf32>
    %223 = vector.shape_cast %222 : vector<1x8x32xf32> to vector<8x32xf32>
    %224 = vector.shape_cast %221 : vector<8x32xf32> to vector<1x8x32xf32>
    tpu.vector_store %arg8[%c0_196, %c0_197, %c0_198], %224 {strides = array<i32>} : memref<2x8x32xf32, #tpu.memory_space<vmem>>, vector<1x8x32xf32>,
    %c0_199 = arith.constant 0 : index
    %c0_200 = arith.constant 0 : index
    %225 = vector.load %arg3[%c0_199, %c0_200] : memref<32x32xf32, #tpu.memory_space<vmem>>, vector<32x32xf32>
    %cst_201 = arith.constant dense<0.000000e+00> : vector<8x32xf32>
    %226 = tpu.matmul %221, %225, %cst_201 {dimension_numbers = #tpu.dot_dimension_numbers<[1], [0], [0], [1], [0, 0, 1, 1], [], []>} : vector<8x32xf32>, vector<32x32xf32>, vector<8x32xf32> -> vector<8x32xf32>
    %c1_202 = arith.constant 1 : index
    %c0_203 = arith.constant 0 : index
    %c0_204 = arith.constant 0 : index
    %227 = vector.load %arg8[%c1_202, %c0_203, %c0_204] : memref<2x8x32xf32, #tpu.memory_space<vmem>>, vector<1x8x32xf32>
    %228 = vector.shape_cast %227 : vector<1x8x32xf32> to vector<8x32xf32>
    %c0_205 = arith.constant 0 : index
    %c0_206 = arith.constant 0 : index
    %229 = vector.load %arg5[%c0_205, %c0_206] : memref<32x32xf32, #tpu.memory_space<vmem>>, vector<32x32xf32>
    %cst_207 = arith.constant dense<0.000000e+00> : vector<8x32xf32>
    %230 = tpu.matmul %228, %229, %cst_207 {dimension_numbers = #tpu.dot_dimension_numbers<[1], [0], [0], [1], [0, 0, 1, 1], [], []>} : vector<8x32xf32>, vector<32x32xf32>, vector<8x32xf32> -> vector<8x32xf32>
    %231 = arith.addf %226, %230 : vector<8x32xf32>
    %c0_208 = arith.constant 0 : index
    %c0_209 = arith.constant 0 : index
    %232 = vector.load %arg4[%c0_208, %c0_209] : memref<1x32xf32, #tpu.memory_space<vmem>>, vector<1x32xf32>
    %233 = vector.broadcast %232 : vector<1x32xf32> to vector<8x32xf32>
    %234 = arith.addf %231, %233 : vector<8x32xf32>
    %235 = math.tanh %234 : vector<8x32xf32>
    %c1_210 = arith.constant 1 : index
    %c0_211 = arith.constant 0 : index
    %c0_212 = arith.constant 0 : index
    %236 = vector.load %arg8[%c1_210, %c0_211, %c0_212] : memref<2x8x32xf32, #tpu.memory_space<vmem>>, vector<1x8x32xf32>
    %237 = vector.shape_cast %236 : vector<1x8x32xf32> to vector<8x32xf32>
    %238 = vector.shape_cast %235 : vector<8x32xf32> to vector<1x8x32xf32>
    tpu.vector_store %arg8[%c1_210, %c0_211, %c0_212], %238 {strides = array<i32>} : memref<2x8x32xf32, #tpu.memory_space<vmem>>, vector<1x8x32xf32>,
    %239 = arith.index_cast %c7_i32 : i32 to index
    %c0_213 = arith.constant 0 : index
    %c0_214 = arith.constant 0 : index
    %240 = vector.load %arg6[%239, %c0_213, %c0_214] : memref<8x8x32xf32, #tpu.memory_space<vmem>>, vector<1x8x32xf32>
    %241 = vector.shape_cast %240 : vector<1x8x32xf32> to vector<8x32xf32>
    %242 = vector.shape_cast %235 : vector<8x32xf32> to vector<1x8x32xf32>
    tpu.vector_store %arg6[%239, %c0_213, %c0_214], %242 {strides = array<i32>} : memref<8x8x32xf32, #tpu.memory_space<vmem>>, vector<1x8x32xf32>,
    %c8_i32 = arith.constant 8 : i32
    %c0_i32_215 = arith.constant 0 : i32
    %243 = arith.cmpi eq, %arg0, %c0_i32_215 : i32
    %244 = arith.extui %243 : i1 to i32
    %c0_i32_216 = arith.constant 0 : i32
    %245 = arith.cmpi ne, %244, %c0_i32_216 : i32
    scf.if %245 {
      %c0_217 = arith.constant 0 : index
      %c0_218 = arith.constant 0 : index
      %c0_219 = arith.constant 0 : index
      %246 = vector.load %arg8[%c0_217, %c0_218, %c0_219] : memref<2x8x32xf32, #tpu.memory_space<vmem>>, vector<2x8x32xf32>
      %c0_220 = arith.constant 0 : index
      %c0_221 = arith.constant 0 : index
      %c0_222 = arith.constant 0 : index
      %247 = vector.load %arg7[%c0_220, %c0_221, %c0_222] : memref<2x8x32xf32, #tpu.memory_space<vmem>>, vector<2x8x32xf32>
      tpu.vector_store %arg7[%c0_220, %c0_221, %c0_222], %246 {strides = array<i32>} : memref<2x8x32xf32, #tpu.memory_space<vmem>>, vector<2x8x32xf32>,
    } else {
    }
    return
  }
  func.func @transform_0(%arg0: i32) -> (i32, i32, i32) {
    %c0_i32 = arith.constant 0 : i32
    %c0_i32_0 = arith.constant 0 : i32
    %c0_i32_1 = arith.constant 0 : i32
    return %arg0, %c0_i32, %c0_i32_0 : i32, i32, i32
  }
  func.func @transform_1(%arg0: i32) -> (i32, i32) {
    %c0_i32 = arith.constant 0 : i32
    %c0_i32_0 = arith.constant 0 : i32
    %c0_i32_1 = arith.constant 0 : i32
    return %c0_i32, %c0_i32_0 : i32, i32
  }
  func.func @transform_2(%arg0: i32) -> (i32, i32) {
    %c0_i32 = arith.constant 0 : i32
    %c0_i32_0 = arith.constant 0 : i32
    %c0_i32_1 = arith.constant 0 : i32
    return %c0_i32, %c0_i32_0 : i32, i32
  }
  func.func @transform_3(%arg0: i32) -> (i32, i32) {
    %c0_i32 = arith.constant 0 : i32
    %c0_i32_0 = arith.constant 0 : i32
    %c0_i32_1 = arith.constant 0 : i32
    return %c0_i32, %c0_i32_0 : i32, i32
  }
  func.func @transform_4(%arg0: i32) -> (i32, i32) {
    %c0_i32 = arith.constant 0 : i32
    %c0_i32_0 = arith.constant 0 : i32
    %c0_i32_1 = arith.constant 0 : i32
    return %c0_i32, %c0_i32_0 : i32, i32
  }
  func.func @transform_5(%arg0: i32) -> (i32, i32, i32) {
    %c0_i32 = arith.constant 0 : i32
    %c0_i32_0 = arith.constant 0 : i32
    %c0_i32_1 = arith.constant 0 : i32
    return %arg0, %c0_i32, %c0_i32_0 : i32, i32, i32
  }
  func.func @transform_6(%arg0: i32) -> (i32, i32, i32) {
    %c0_i32 = arith.constant 0 : i32
    %c0_i32_0 = arith.constant 0 : i32
    %c0_i32_1 = arith.constant 0 : i32
    %c0_i32_2 = arith.constant 0 : i32
    return %c0_i32, %c0_i32_0, %c0_i32_1 : i32, i32, i32
  }
}

</mosaic_0001>

<bundles_post_ra>
// kernel: tpu_custom_call.1
= control target key start
LH: loop header
LB: loop body
LE: loop exit
PB: predicated region body
PF: predicated region fallthrough
CT: control target
= control target key end

     0   :  { %12 = vsyncpa [#allocation4], 0  ;;  %s3246_s0 = inlined_call_operand.hbm [shape: f32[8,8,32], index: 0, kind: input, shape index: {}]   ;;  %s3247_s1 = inlined_call_operand.hbm [shape: f32[32,32], index: 1, kind: input, shape index: {}]   ;;  %s3248_s2 = inlined_call_operand.hbm [shape: f32[32,32], index: 2, kind: input, shape index: {}]   ;;  %s3249_s3 = inlined_call_operand.vmem [shape: f32[1,32], index: 3, kind: input, shape index: {}]   ;;  %s3250_s4 = inlined_call_operand.hbm [shape: f32[32,32], index: 4, kind: input, shape index: {}]   ;;  %s3251_s5 = inlined_call_operand.hbm [shape: f32[8,8,32], index: 5, kind: output, shape index: {0}]   ;;  %s3252_s6 = inlined_call_operand.hbm [shape: f32[2,8,32], index: 6, kind: output, shape index: {1}]  }
   0x1   :  { %13 = vsyncpa [#allocation7], 0 }
   0x2   :  { %14 = vsyncpa [#allocation10], 0 }
   0x3   :  { %15 = vsyncpa [#allocation5], 0 }
   0x4   :  { %16 = vsyncpa [#allocation13], 0  ;;  %s2873_s21 = smov [#allocation6]   ;;  %s2874_s23 = smov [#allocation3]  }
   0x5   :  { %s34_s22 = sshll.u32 %s2873_s21, 4  ;;  %s22_s24 = sshll.u32 %s2874_s23, 4  ;;  %s35_s22 = int_to_ptr.vmem [resolvable:$true] %s34_s22  ;;  %s2919_s24 = int_to_ptr.vmem [resolvable:$true] %s22_s24 }
   0x6   :  { %s2731_s27 = scalar_lea.hbm %s3247_s1, 512 }
   0x7   :  { %p2732_p0 = scmp.ne.s32.totalorder %s3247_s1, %s2731_s27  ;;  %p2735_p1 = scmp.lt.u32.totalorder %s2731_s27, %s3247_s1 }
   0x9   :  { %p2737_p2 = pnand %p2735_p1, %p2732_p0 }
   0xb   :  { %2740 = shalt.err (!%p2737_p2)
}
   0xc   :  { %s2741_s8 = scalar_lea.vmem %s35_s22, 512  ;;  %p2746_p4 = scmp.lt.s32.totalorder %s35_s22, %s35_s22 }
   0xd   :  { %p2742_p3 = scmp.ne.s32.totalorder %s35_s22, %s2741_s8  ;;  %p2747_p5 = scmp.lt.s32.totalorder %s2741_s8, %s2741_s8 }
   0xf   :  { %p2748_p6 = por %p2747_p5, %p2746_p4 }
  0x11   :  { %p2749_p7 = pnand %p2748_p6, %p2742_p3 }
  0x13   :  { %2752 = shalt.err (!%p2749_p7)
}
  0x14   :  { %s2875_s9 = smov 128   ;;  %s2876_s10 = smov 8  }
  0x15   :  { %40 = dma.hbm_to_vmem [thread:$0]  %s3247_s1, 512, %s35_s22, [#allocation7], %s2875_s9, %s2875_s9, %s2876_s10  }
  0x16   :  { %s2753_s15 = scalar_lea.hbm %s3246_s0, 1024 }
  0x17   :  { %p2754_p8 = scmp.ne.s32.totalorder %s3246_s0, %s2753_s15  ;;  %p2757_p9 = scmp.lt.u32.totalorder %s2753_s15, %s3246_s0 }
  0x19   :  { %p2759_p10 = pnand %p2757_p9, %p2754_p8 }
  0x1b   :  { %2762 = shalt.err (!%p2759_p10)
}
  0x1c   :  { %s2763_s20 = scalar_lea.vmem %s2919_s24, 1024  ;;  %p2768_p12 = scmp.lt.s32.totalorder %s2919_s24, %s2919_s24 }
  0x1d   :  { %p2764_p11 = scmp.ne.s32.totalorder %s2919_s24, %s2763_s20  ;;  %p2769_p13 = scmp.lt.s32.totalorder %s2763_s20, %s2763_s20 }
  0x1f   :  { %p2770_p0 = por %p2769_p13, %p2768_p12 }
  0x21   :  { %p2771_p1 = pnand %p2770_p0, %p2764_p11 }
  0x23   :  { %2774 = shalt.err (!%p2771_p1)
}
  0x24   :  { %28 = dma.hbm_to_vmem [thread:$0]  %s3246_s0, 1024, %s2919_s24, [#allocation4], %s2875_s9, %s2875_s9, %s2876_s10  }
  0x25   :  { %s2877_s22 = smov [#allocation8]   ;;  %s2878_s25 = smov [#allocation9]  }
  0x26   :  { %s46_s23 = sshll.u32 %s2877_s22, 4  ;;  %s60_s26 = sshll.u32 %s2878_s25, 4  ;;  %s47_s23 = int_to_ptr.vmem [resolvable:$true] %s46_s23  ;;  %s2956_s26 = int_to_ptr.vmem [resolvable:$true] %s60_s26 }
  0x27   :  { %s2775_s29 = scalar_lea.hbm %s3248_s2, 512 }
  0x28   :  { %p2776_p2 = scmp.ne.s32.totalorder %s3248_s2, %s2775_s29  ;;  %p2779_p3 = scmp.lt.u32.totalorder %s2775_s29, %s3248_s2 }
  0x2a   :  { %p2781_p4 = pnand %p2779_p3, %p2776_p2 }
  0x2c   :  { %2784 = shalt.err (!%p2781_p4)
}
  0x2d   :  { %s2785_s0 = scalar_lea.vmem %s47_s23, 512  ;;  %p2790_p6 = scmp.lt.s32.totalorder %s47_s23, %s47_s23 }
  0x2e   :  { %p2786_p5 = scmp.ne.s32.totalorder %s47_s23, %s2785_s0  ;;  %p2791_p7 = scmp.lt.s32.totalorder %s2785_s0, %s2785_s0 }
  0x30   :  { %p2792_p8 = por %p2791_p7, %p2790_p6 }
  0x32   :  { %p2793_p9 = pnand %p2792_p8, %p2786_p5 }
  0x34   :  { %2796 = shalt.err (!%p2793_p9)
}
  0x35   :  { %52 = dma.hbm_to_vmem [thread:$0]  %s3248_s2, 512, %s47_s23, [#allocation7], %s2875_s9, %s2875_s9, %s2876_s10  }
  0x36   :  { %s2797_s15 = scalar_lea.hbm %s3250_s4, 512 }
  0x37   :  { %p2798_p10 = scmp.ne.s32.totalorder %s3250_s4, %s2797_s15  ;;  %p2801_p11 = scmp.lt.u32.totalorder %s2797_s15, %s3250_s4 }
  0x39   :  { %p2803_p12 = pnand %p2801_p11, %p2798_p10 }
  0x3b   :  { %2806 = shalt.err (!%p2803_p12)
}
  0x3c   :  { %s2807_s20 = scalar_lea.vmem %s2956_s26, 512  ;;  %p2812_p0 = scmp.lt.s32.totalorder %s2956_s26, %s2956_s26 }
  0x3d   :  { %p2808_p13 = scmp.ne.s32.totalorder %s2956_s26, %s2807_s20  ;;  %p2813_p1 = scmp.lt.s32.totalorder %s2807_s20, %s2807_s20 }
  0x3f   :  { %p2814_p2 = por %p2813_p1, %p2812_p0 }
  0x41   :  { %p2815_p3 = pnand %p2814_p2, %p2808_p13 }
  0x43   :  { %2818 = shalt.err (!%p2815_p3)
}
  0x44   :  { %66 = dma.hbm_to_vmem [thread:$0]  %s3250_s4, 512, %s2956_s26, [#allocation10], %s2875_s9, %s2875_s9, %s2876_s10  }
  0x45   :  { %2863 = dma.done.wait [#allocation4], 1024  }
  0x46   :  { %2864 = vsyncadd [#allocation4], 4294966272 }
  0x47   :  { %2865 = dma.done.wait [#allocation7], 1024  }
  0x48   :  { %2866 = vsyncadd [#allocation7], 4294966272 }
  0x49   :  { %2867 = dma.done.wait [#allocation10], 512  }
  0x4a   :  { %2868 = vsyncadd [#allocation10], 4294966784  ;;  %vm83_vm0 = vcmask 261120   ;;  %v2879_v0 = vmov 0.0|0.0   ;;  %vm2880_vm1 = vmmov 0   ;;  %v2881_v1 = vmov 0.0  }
  0x4b   :  { %2544 = vmatprep.subr.bf16.mxu0 %v2879_v0  ;;  %2288 = vmatprep.mubr.msk.f32.mxu0 %vm2880_vm1, %v2881_v1  ;;  %84 = vst.msk [vmem:[#allocation2] sm:$0xff] %vm83_vm0, %v2881_v1  ;;  %85 = vst.msk [vmem:[#allocation2 + $0x8] sm:$0xff] %vm83_vm0, %v2881_v1  ;;  %v88_v2 = vld [vmem:[#allocation6] sm:$0xff]  ;;  %v89_v3 = vld [vmem:[#allocation6 + $0x8] sm:$0xff] }
  0x4c   :  { %2550 = vmatprep.subr.bf16.mxu1 %v2879_v0  ;;  %2299 = vmatprep.mubr.msk.f32.mxu1 %vm2880_vm1, %v2881_v1  ;;  %v90_v4 = vld [vmem:[#allocation6 + $0x10] sm:$0xff]  ;;  %v3003_v5 = vpack.c.bf16 %v89_v3, %v88_v2  ;;  %v91_v6 = vld [vmem:[#allocation6 + $0x18] sm:$0xff]  ;;  %v175_v9 = vld [vmem:[#allocation9] sm:$0xff] }
  0x4d   :  { %v3006_v7 = vpack.c.bf16 %v91_v6, %v90_v4  ;;  %v176_v10 = vld [vmem:[#allocation9 + $0x8] sm:$0xff]  ;;  %v169_v12 = vld [vmem:[#allocation8] sm:$0xff]  ;;  %v177_v15 = vld [vmem:[#allocation9 + $0x10] sm:$0xff] }
  0x4e   :  { %2546 = vmatpush3.bf16.msra.mxu0 %v3003_v5  ;;  %v3014_v11 = vpack.c.bf16 %v176_v10, %v175_v9  ;;  %v170_v13 = vld [vmem:[#allocation8 + $0x8] sm:$0xff]  ;;  %v178_v16 = vld [vmem:[#allocation9 + $0x18] sm:$0xff]  ;;  %v171_v18 = vld [vmem:[#allocation8 + $0x10] sm:$0xff] }
  0x4f   :  { %2547 = vmatprep.subr.bf16.mxu0 %v2879_v0  ;;  %v3016_v14 = vpack.c.bf16 %v170_v13, %v169_v12  ;;  %v3021_v17 = vpack.c.bf16 %v178_v16, %v177_v15  ;;  %v172_v19 = vld [vmem:[#allocation8 + $0x18] sm:$0xff]  ;;  %v86_v22 = vld [vmem:[#allocation3] sm:$0xff]  ;;  %v3055_v31 = vld [vmem:[%s3249_s3] ss:$0 sm:$0xff]  ;;  %s2882_s3 = smov [#allocation11]  }
  0x50   :  { %2552 = vmatpush3.bf16.msra.mxu1 %v3014_v11  ;;  %v3024_v20 = vpack.c.bf16 %v172_v19, %v171_v18  ;;  %v337_v35 = vld [vmem:[#allocation3 + $0x8] sm:$0xff]  ;;  %v587_v49 = vld [vmem:[#allocation3 + $0x10] sm:$0xff]  ;;  %v837_v63 = vld [vmem:[#allocation3 + $0x18] sm:$0xff]  ;;  %s2098_s22 = sshll.u32 %s2882_s3, 4  ;;  %s2099_s22 = int_to_ptr.vmem [resolvable:$true] %s2098_s22 }
  0x51   :  { %2553 = vmatprep.subr.bf16.mxu1 %v2879_v0  ;;  %s2819_s23 = scalar_lea.vmem %s2099_s22, 1024  ;;  %p2824_p5 = scmp.lt.s32.totalorder %s2099_s22, %s2099_s22 }
  0x52   :  { %2549 = vmatpush3.bf16.msra.mxu0 %v3006_v7  ;;  %v87_v8 = vld [vmem:[#allocation2] sm:$0xff]  ;;  %v174_v21 = vld [vmem:[#allocation2 + $0x8] sm:$0xff]  ;;  %p2820_p4 = scmp.ne.s32.totalorder %s2099_s22, %s2819_s23  ;;  %p2825_p6 = scmp.lt.s32.totalorder %s2819_s23, %s2819_s23 }
  0x53   :  { %2556 = vmatprep.subr.bf16.mxu0 %v2879_v0 }
  0x54   :  { %2555 = vmatpush3.bf16.msra.mxu1 %v3021_v17  ;;  %p2826_p7 = por %p2825_p6, %p2824_p5 }
  0x55   :  { %2289 = vmatmul.mubr.msk.f32.vlgmr.msra.gmra.mrb[0].mxu0 %vm83_vm0, %v87_v8  ;;  %2562 = vmatprep.subr.bf16.mxu1 %v2879_v0 }
  0x56   :  { %2310 = vmatprep.mubr.msk.f32.mxu0 %vm2880_vm1, %v2881_v1  ;;  %2558 = vmatpush3.bf16.msra.mxu0 %v3016_v14  ;;  %p2827_p8 = pnand %p2826_p7, %p2820_p4 }
  0x57   :  { %2559 = vmatprep.subr.bf16.mxu0 %v2879_v0  ;;  %2300 = vmatmul.mubr.msk.f32.vlgmr.msra.gmra.mrb[0].mxu1 %vm83_vm0, %v174_v21  ;;  %v1087_v21 = vld [vmem:[#allocation3 + $0x20] sm:$0xff] }
  0x58   :  { %2564 = vmatpush3.bf16.msra.mxu1 %v3003_v5  ;;  %2321 = vmatprep.mubr.msk.f32.mxu1 %vm2880_vm1, %v2881_v1 }
  0x59   :  { %2565 = vmatprep.subr.bf16.mxu1 %v2879_v0 }
  0x5a   :  { %2561 = vmatpush3.bf16.msra.mxu0 %v3024_v20 }
  0x5b   :  { %2568 = vmatprep.subr.bf16.mxu0 %v2879_v0 }
  0x5c   :  { %2567 = vmatpush3.bf16.msra.mxu1 %v3006_v7 }
  0x5d   :  { %2574 = vmatprep.subr.bf16.mxu1 %v2879_v0 }
 0x128   :  { %v162_v23 = vpop.f32.mrb[0].mxu0 }
 0x129   :  { %v166_v24 = vadd.f32 %v162_v23, %v86_v22  ;;  %v2290_v25 = vpop.f32.mrb[1].mxu0 }
 0x12a   :  { %v248_v28 = vpop.f32.mrb[0].mxu1 }
 0x12b   :  { %2699 = vtanh.f32 %v166_v24  ;;  %v2301_v29 = vpop.f32.mrb[1].mxu1 }
 0x135   :  { %v2700_v26 = vpop.eup %2699 }
 0x136   :  { %168 = vst.msk [vmem:[#allocation2] sm:$0xff] %vm83_vm0, %v2700_v26  ;;  %2311 = vmatmul.mubr.msk.f32.vlgmr.msra.gmra.mrb[2].mxu0 %vm83_vm0, %v2700_v26 }
 0x137   :  { %2570 = vmatpush3.bf16.msra.mxu0 %v3014_v11  ;;  %2332 = vmatprep.mubr.msk.f32.mxu0 %vm2880_vm1, %v2881_v1 }
 0x138   :  { %2571 = vmatprep.subr.bf16.mxu0 %v2879_v0 }
 0x13b   :  { %2573 = vmatpush3.bf16.msra.mxu0 %v3021_v17 }
 0x13c   :  { %2580 = vmatprep.subr.bf16.mxu0 %v2879_v0 }
 0x13d   :  { %v338_v27 = vld [vmem:[#allocation2] sm:$0xff] }
 0x13e   :  { %2322 = vmatmul.mubr.msk.f32.vlgmr.msra.gmra.mrb[2].mxu1 %vm83_vm0, %v338_v27 }
 0x13f   :  { %2576 = vmatpush3.bf16.msra.mxu1 %v3016_v14  ;;  %2343 = vmatprep.mubr.msk.f32.mxu1 %vm2880_vm1, %v2881_v1 }
 0x140   :  { %2577 = vmatprep.subr.bf16.mxu1 %v2879_v0 }
 0x143   :  { %2579 = vmatpush3.bf16.msra.mxu1 %v3024_v20 }
 0x144   :  { %2586 = vmatprep.subr.bf16.mxu1 %v2879_v0 }
 0x209   :  { %v321_v30 = vpop.f32.mrb[2].mxu0 }
 0x20a   :  { %v322_v32 = vadd.f32 %v321_v30, %v248_v28  ;;  %v2312_v33 = vpop.f32.mrb[3].mxu0 }
 0x20c   :  { %v332_v34 = vadd.f32 %v3055_v31, %v322_v32 }
 0x20e   :  { %2701 = vtanh.f32 %v332_v34 }
 0x211   :  { %v412_v36 = vpop.f32.mrb[2].mxu1 }
 0x212   :  { %v416_v37 = vadd.f32 %v412_v36, %v337_v35  ;;  %v2323_v38 = vpop.f32.mrb[3].mxu1  ;;  %v1337_v36 = vld [vmem:[#allocation3 + $0x28] sm:$0xff] }
 0x214   :  { %2703 = vtanh.f32 %v416_v37 }
 0x218   :  { %v2702_v39 = vpop.eup %2701 }
 0x219   :  { %334 = vst.msk [vmem:[#allocation2 + $0x8] sm:$0xff] %vm83_vm0, %v2702_v39  ;;  %335 = vst.msk [vmem:[#allocation11] sm:$0xff] %vm83_vm0, %v2702_v39 }
 0x21e   :  { %v2704_v40 = vpop.eup %2703 }
 0x21f   :  { %418 = vst.msk [vmem:[#allocation2] sm:$0xff] %vm83_vm0, %v2704_v40  ;;  %2344 = vmatmul.mubr.msk.f32.vlgmr.msra.gmra.mrb[4].mxu1 %vm83_vm0, %v2704_v40 }
 0x220   :  { %v423_v41 = vld [vmem:[#allocation2 + $0x8] sm:$0xff]  ;;  %2588 = vmatpush3.bf16.msra.mxu1 %v3014_v11  ;;  %2365 = vmatprep.mubr.msk.f32.mxu1 %vm2880_vm1, %v2881_v1 }
 0x221   :  { %2333 = vmatmul.mubr.msk.f32.vlgmr.msra.gmra.mrb[4].mxu0 %vm83_vm0, %v423_v41  ;;  %2589 = vmatprep.subr.bf16.mxu1 %v2879_v0 }
 0x222   :  { %2582 = vmatpush3.bf16.msra.mxu0 %v3003_v5  ;;  %2354 = vmatprep.mubr.msk.f32.mxu0 %vm2880_vm1, %v2881_v1 }
 0x223   :  { %2583 = vmatprep.subr.bf16.mxu0 %v2879_v0 }
 0x224   :  { %2591 = vmatpush3.bf16.msra.mxu1 %v3021_v17 }
 0x225   :  { %2598 = vmatprep.subr.bf16.mxu1 %v2879_v0 }
 0x226   :  { %2585 = vmatpush3.bf16.msra.mxu0 %v3006_v7  ;;  %v588_v42 = vld [vmem:[#allocation2] sm:$0xff] }
 0x227   :  { %2592 = vmatprep.subr.bf16.mxu0 %v2879_v0 }
 0x229   :  { %2355 = vmatmul.mubr.msk.f32.vlgmr.msra.gmra.mrb[6].mxu0 %vm83_vm0, %v588_v42 }
 0x22a   :  { %2594 = vmatpush3.bf16.msra.mxu0 %v3016_v14  ;;  %2376 = vmatprep.mubr.msk.f32.mxu0 %vm2880_vm1, %v2881_v1 }
 0x22b   :  { %2595 = vmatprep.subr.bf16.mxu0 %v2879_v0 }
 0x22e   :  { %2597 = vmatpush3.bf16.msra.mxu0 %v3024_v20 }
 0x22f   :  { %2604 = vmatprep.subr.bf16.mxu0 %v2879_v0 }
 0x2f2   :  { %v570_v43 = vpop.f32.mrb[4].mxu1 }
 0x2f3   :  { %v2345_v44 = vpop.f32.mrb[5].mxu1 }
 0x2f4   :  { %v497_v45 = vpop.f32.mrb[4].mxu0 }
 0x2f5   :  { %v571_v46 = vadd.f32 %v570_v43, %v497_v45  ;;  %v2334_v47 = vpop.f32.mrb[5].mxu0 }
 0x2f7   :  { %v581_v48 = vadd.f32 %v3055_v31, %v571_v46 }
 0x2f9   :  { %2705 = vtanh.f32 %v581_v48 }
 0x2fc   :  { %v662_v50 = vpop.f32.mrb[6].mxu0 }
 0x2fd   :  { %v666_v51 = vadd.f32 %v662_v50, %v587_v49  ;;  %v2356_v52 = vpop.f32.mrb[7].mxu0  ;;  %v1587_v50 = vld [vmem:[#allocation3 + $0x30] sm:$0xff] }
 0x2ff   :  { %2707 = vtanh.f32 %v666_v51 }
 0x303   :  { %v2706_v53 = vpop.eup %2705 }
 0x304   :  { %583 = vst.msk [vmem:[#allocation2 + $0x8] sm:$0xff] %vm83_vm0, %v2706_v53  ;;  %585 = vst.msk [vmem:[#allocation11 + $0x8] sm:$0xff] %vm83_vm0, %v2706_v53 }
 0x309   :  { %v2708_v54 = vpop.eup %2707 }
 0x30a   :  { %668 = vst.msk [vmem:[#allocation2] sm:$0xff] %vm83_vm0, %v2708_v54  ;;  %2377 = vmatmul.mubr.msk.f32.vlgmr.msra.gmra.mrb[8].mxu0 %vm83_vm0, %v2708_v54 }
 0x30b   :  { %v673_v55 = vld [vmem:[#allocation2 + $0x8] sm:$0xff]  ;;  %2606 = vmatpush3.bf16.msra.mxu0 %v3014_v11  ;;  %2398 = vmatprep.mubr.msk.f32.mxu0 %vm2880_vm1, %v2881_v1 }
 0x30c   :  { %2366 = vmatmul.mubr.msk.f32.vlgmr.msra.gmra.mrb[6].mxu1 %vm83_vm0, %v673_v55  ;;  %2607 = vmatprep.subr.bf16.mxu0 %v2879_v0 }
 0x30d   :  { %2600 = vmatpush3.bf16.msra.mxu1 %v3003_v5  ;;  %2387 = vmatprep.mubr.msk.f32.mxu1 %vm2880_vm1, %v2881_v1 }
 0x30e   :  { %2601 = vmatprep.subr.bf16.mxu1 %v2879_v0 }
 0x30f   :  { %2609 = vmatpush3.bf16.msra.mxu0 %v3021_v17 }
 0x310   :  { %2616 = vmatprep.subr.bf16.mxu0 %v2879_v0 }
 0x311   :  { %2603 = vmatpush3.bf16.msra.mxu1 %v3006_v7  ;;  %v838_v56 = vld [vmem:[#allocation2] sm:$0xff] }
 0x312   :  { %2610 = vmatprep.subr.bf16.mxu1 %v2879_v0 }
 0x314   :  { %2388 = vmatmul.mubr.msk.f32.vlgmr.msra.gmra.mrb[8].mxu1 %vm83_vm0, %v838_v56 }
 0x315   :  { %2612 = vmatpush3.bf16.msra.mxu1 %v3016_v14  ;;  %2409 = vmatprep.mubr.msk.f32.mxu1 %vm2880_vm1, %v2881_v1 }
 0x316   :  { %2613 = vmatprep.subr.bf16.mxu1 %v2879_v0 }
 0x319   :  { %2615 = vmatpush3.bf16.msra.mxu1 %v3024_v20 }
 0x31a   :  { %2622 = vmatprep.subr.bf16.mxu1 %v2879_v0 }
 0x3dd   :  { %v820_v57 = vpop.f32.mrb[8].mxu0 }
 0x3de   :  { %v2378_v58 = vpop.f32.mrb[9].mxu0 }
 0x3df   :  { %v747_v59 = vpop.f32.mrb[6].mxu1 }
 0x3e0   :  { %v821_v60 = vadd.f32 %v820_v57, %v747_v59  ;;  %v2367_v61 = vpop.f32.mrb[7].mxu1 }
 0x3e2   :  { %v831_v62 = vadd.f32 %v3055_v31, %v821_v60  ;;  %v1837_v60 = vld [vmem:[#allocation3 + $0x38] sm:$0xff] }
 0x3e4   :  { %2709 = vtanh.f32 %v831_v62 }
 0x3e7   :  { %v912_v2 = vpop.f32.mrb[8].mxu1 }
 0x3e8   :  { %v916_v3 = vadd.f32 %v912_v2, %v837_v63  ;;  %v2389_v4 = vpop.f32.mrb[9].mxu1 }
 0x3ea   :  { %2711 = vtanh.f32 %v916_v3 }
 0x3ee   :  { %v2710_v6 = vpop.eup %2709 }
 0x3ef   :  { %833 = vst.msk [vmem:[#allocation2 + $0x8] sm:$0xff] %vm83_vm0, %v2710_v6  ;;  %835 = vst.msk [vmem:[#allocation11 + $0x10] sm:$0xff] %vm83_vm0, %v2710_v6 }
 0x3f4   :  { %v2712_v8 = vpop.eup %2711 }
 0x3f5   :  { %918 = vst.msk [vmem:[#allocation2] sm:$0xff] %vm83_vm0, %v2712_v8  ;;  %2410 = vmatmul.mubr.msk.f32.vlgmr.msra.gmra.mrb[10].mxu1 %vm83_vm0, %v2712_v8 }
 0x3f6   :  { %v923_v9 = vld [vmem:[#allocation2 + $0x8] sm:$0xff]  ;;  %2624 = vmatpush3.bf16.msra.mxu1 %v3014_v11  ;;  %2431 = vmatprep.mubr.msk.f32.mxu1 %vm2880_vm1, %v2881_v1 }
 0x3f7   :  { %2399 = vmatmul.mubr.msk.f32.vlgmr.msra.gmra.mrb[10].mxu0 %vm83_vm0, %v923_v9  ;;  %2625 = vmatprep.subr.bf16.mxu1 %v2879_v0 }
 0x3f8   :  { %2618 = vmatpush3.bf16.msra.mxu0 %v3003_v5  ;;  %2420 = vmatprep.mubr.msk.f32.mxu0 %vm2880_vm1, %v2881_v1 }
 0x3f9   :  { %2619 = vmatprep.subr.bf16.mxu0 %v2879_v0 }
 0x3fa   :  { %2627 = vmatpush3.bf16.msra.mxu1 %v3021_v17 }
 0x3fb   :  { %2634 = vmatprep.subr.bf16.mxu1 %v2879_v0 }
 0x3fc   :  { %2621 = vmatpush3.bf16.msra.mxu0 %v3006_v7  ;;  %v1088_v10 = vld [vmem:[#allocation2] sm:$0xff] }
 0x3fd   :  { %2628 = vmatprep.subr.bf16.mxu0 %v2879_v0 }
 0x3ff   :  { %2421 = vmatmul.mubr.msk.f32.vlgmr.msra.gmra.mrb[12].mxu0 %vm83_vm0, %v1088_v10 }
 0x400   :  { %2630 = vmatpush3.bf16.msra.mxu0 %v3016_v14  ;;  %2442 = vmatprep.mubr.msk.f32.mxu0 %vm2880_vm1, %v2881_v1 }
 0x401   :  { %2631 = vmatprep.subr.bf16.mxu0 %v2879_v0 }
 0x404   :  { %2633 = vmatpush3.bf16.msra.mxu0 %v3024_v20 }
 0x405   :  { %2640 = vmatprep.subr.bf16.mxu0 %v2879_v0 }
 0x4c8   :  { %v1070_v12 = vpop.f32.mrb[10].mxu1 }
 0x4c9   :  { %v2411_v13 = vpop.f32.mrb[11].mxu1 }
 0x4ca   :  { %v997_v15 = vpop.f32.mrb[10].mxu0 }
 0x4cb   :  { %v1071_v16 = vadd.f32 %v1070_v12, %v997_v15  ;;  %v2400_v18 = vpop.f32.mrb[11].mxu0 }
 0x4cd   :  { %v1081_v19 = vadd.f32 %v3055_v31, %v1071_v16 }
 0x4cf   :  { %2713 = vtanh.f32 %v1081_v19 }
 0x4d2   :  { %v1162_v22 = vpop.f32.mrb[12].mxu0 }
 0x4d3   :  { %v1166_v23 = vadd.f32 %v1162_v22, %v1087_v21  ;;  %v2422_v24 = vpop.f32.mrb[13].mxu0 }
 0x4d5   :  { %2715 = vtanh.f32 %v1166_v23 }
 0x4d9   :  { %v2714_v25 = vpop.eup %2713 }
 0x4da   :  { %1083 = vst.msk [vmem:[#allocation2 + $0x8] sm:$0xff] %vm83_vm0, %v2714_v25  ;;  %1085 = vst.msk [vmem:[#allocation11 + $0x18] sm:$0xff] %vm83_vm0, %v2714_v25 }
 0x4df   :  { %v2716_v26 = vpop.eup %2715 }
 0x4e0   :  { %1168 = vst.msk [vmem:[#allocation2] sm:$0xff] %vm83_vm0, %v2716_v26  ;;  %2443 = vmatmul.mubr.msk.f32.vlgmr.msra.gmra.mrb[14].mxu0 %vm83_vm0, %v2716_v26 }
 0x4e1   :  { %v1173_v27 = vld [vmem:[#allocation2 + $0x8] sm:$0xff]  ;;  %2642 = vmatpush3.bf16.msra.mxu0 %v3014_v11  ;;  %2464 = vmatprep.mubr.msk.f32.mxu0 %vm2880_vm1, %v2881_v1 }
 0x4e2   :  { %2432 = vmatmul.mubr.msk.f32.vlgmr.msra.gmra.mrb[12].mxu1 %vm83_vm0, %v1173_v27  ;;  %2643 = vmatprep.subr.bf16.mxu0 %v2879_v0 }
 0x4e3   :  { %2636 = vmatpush3.bf16.msra.mxu1 %v3003_v5  ;;  %2453 = vmatprep.mubr.msk.f32.mxu1 %vm2880_vm1, %v2881_v1 }
 0x4e4   :  { %2637 = vmatprep.subr.bf16.mxu1 %v2879_v0 }
 0x4e5   :  { %2645 = vmatpush3.bf16.msra.mxu0 %v3021_v17 }
 0x4e6   :  { %2652 = vmatprep.subr.bf16.mxu0 %v2879_v0 }
 0x4e7   :  { %2639 = vmatpush3.bf16.msra.mxu1 %v3006_v7  ;;  %v1338_v28 = vld [vmem:[#allocation2] sm:$0xff] }
 0x4e8   :  { %2646 = vmatprep.subr.bf16.mxu1 %v2879_v0 }
 0x4ea   :  { %2454 = vmatmul.mubr.msk.f32.vlgmr.msra.gmra.mrb[14].mxu1 %vm83_vm0, %v1338_v28 }
 0x4eb   :  { %2648 = vmatpush3.bf16.msra.mxu1 %v3016_v14  ;;  %2475 = vmatprep.mubr.msk.f32.mxu1 %vm2880_vm1, %v2881_v1 }
 0x4ec   :  { %2649 = vmatprep.subr.bf16.mxu1 %v2879_v0 }
 0x4ef   :  { %2651 = vmatpush3.bf16.msra.mxu1 %v3024_v20 }
 0x4f0   :  { %2658 = vmatprep.subr.bf16.mxu1 %v2879_v0 }
 0x5b3   :  { %v1320_v29 = vpop.f32.mrb[14].mxu0 }
 0x5b4   :  { %v2444_v30 = vpop.f32.mrb[15].mxu0 }
 0x5b5   :  { %v1247_v32 = vpop.f32.mrb[12].mxu1 }
 0x5b6   :  { %v1321_v33 = vadd.f32 %v1320_v29, %v1247_v32  ;;  %v2433_v34 = vpop.f32.mrb[13].mxu1 }
 0x5b8   :  { %v1331_v35 = vadd.f32 %v3055_v31, %v1321_v33 }
 0x5ba   :  { %2717 = vtanh.f32 %v1331_v35 }
 0x5bd   :  { %v1412_v37 = vpop.f32.mrb[14].mxu1 }
 0x5be   :  { %v1416_v38 = vadd.f32 %v1412_v37, %v1337_v36  ;;  %v2455_v39 = vpop.f32.mrb[15].mxu1 }
 0x5c0   :  { %2719 = vtanh.f32 %v1416_v38 }
 0x5c4   :  { %v2718_v40 = vpop.eup %2717 }
 0x5c5   :  { %1333 = vst.msk [vmem:[#allocation2 + $0x8] sm:$0xff] %vm83_vm0, %v2718_v40  ;;  %1335 = vst.msk [vmem:[#allocation11 + $0x20] sm:$0xff] %vm83_vm0, %v2718_v40 }
 0x5ca   :  { %v2720_v41 = vpop.eup %2719 }
 0x5cb   :  { %1418 = vst.msk [vmem:[#allocation2] sm:$0xff] %vm83_vm0, %v2720_v41  ;;  %2476 = vmatmul.mubr.msk.f32.vlgmr.msra.gmra.mrb[16].mxu1 %vm83_vm0, %v2720_v41 }
 0x5cc   :  { %v1423_v42 = vld [vmem:[#allocation2 + $0x8] sm:$0xff]  ;;  %2660 = vmatpush3.bf16.msra.mxu1 %v3014_v11  ;;  %2497 = vmatprep.mubr.msk.f32.mxu1 %vm2880_vm1, %v2881_v1 }
 0x5cd   :  { %2465 = vmatmul.mubr.msk.f32.vlgmr.msra.gmra.mrb[16].mxu0 %vm83_vm0, %v1423_v42  ;;  %2661 = vmatprep.subr.bf16.mxu1 %v2879_v0 }
 0x5ce   :  { %2654 = vmatpush3.bf16.msra.mxu0 %v3003_v5  ;;  %2486 = vmatprep.mubr.msk.f32.mxu0 %vm2880_vm1, %v2881_v1 }
 0x5cf   :  { %2655 = vmatprep.subr.bf16.mxu0 %v2879_v0 }
 0x5d0   :  { %2663 = vmatpush3.bf16.msra.mxu1 %v3021_v17 }
 0x5d1   :  { %2670 = vmatprep.subr.bf16.mxu1 %v2879_v0 }
 0x5d2   :  { %2657 = vmatpush3.bf16.msra.mxu0 %v3006_v7  ;;  %v1588_v43 = vld [vmem:[#allocation2] sm:$0xff] }
 0x5d3   :  { %2664 = vmatprep.subr.bf16.mxu0 %v2879_v0 }
 0x5d5   :  { %2487 = vmatmul.mubr.msk.f32.vlgmr.msra.gmra.mrb[18].mxu0 %vm83_vm0, %v1588_v43 }
 0x5d6   :  { %2666 = vmatpush3.bf16.msra.mxu0 %v3016_v14  ;;  %2508 = vmatprep.mubr.msk.f32.mxu0 %vm2880_vm1, %v2881_v1 }
 0x5d7   :  { %2667 = vmatprep.subr.bf16.mxu0 %v2879_v0 }
 0x5da   :  { %2669 = vmatpush3.bf16.msra.mxu0 %v3024_v20 }
 0x5db   :  { %2676 = vmatprep.subr.bf16.mxu0 %v2879_v0 }
 0x69e   :  { %v1570_v44 = vpop.f32.mrb[16].mxu1 }
 0x69f   :  { %v2477_v45 = vpop.f32.mrb[17].mxu1 }
 0x6a0   :  { %v1497_v46 = vpop.f32.mrb[16].mxu0 }
 0x6a1   :  { %v1571_v47 = vadd.f32 %v1570_v44, %v1497_v46  ;;  %v2466_v48 = vpop.f32.mrb[17].mxu0 }
 0x6a3   :  { %v1581_v49 = vadd.f32 %v3055_v31, %v1571_v47 }
 0x6a5   :  { %2721 = vtanh.f32 %v1581_v49 }
 0x6a8   :  { %v1662_v51 = vpop.f32.mrb[18].mxu0 }
 0x6a9   :  { %v1666_v52 = vadd.f32 %v1662_v51, %v1587_v50  ;;  %v2488_v53 = vpop.f32.mrb[19].mxu0 }
 0x6ab   :  { %2723 = vtanh.f32 %v1666_v52 }
 0x6af   :  { %v2722_v54 = vpop.eup %2721 }
 0x6b0   :  { %1583 = vst.msk [vmem:[#allocation2 + $0x8] sm:$0xff] %vm83_vm0, %v2722_v54  ;;  %1585 = vst.msk [vmem:[#allocation11 + $0x28] sm:$0xff] %vm83_vm0, %v2722_v54 }
 0x6b5   :  { %v2724_v55 = vpop.eup %2723 }
 0x6b6   :  { %1668 = vst.msk [vmem:[#allocation2] sm:$0xff] %vm83_vm0, %v2724_v55  ;;  %2509 = vmatmul.mubr.msk.f32.vlgmr.msra.gmra.mrb[20].mxu0 %vm83_vm0, %v2724_v55 }
 0x6b7   :  { %v1673_v56 = vld [vmem:[#allocation2 + $0x8] sm:$0xff]  ;;  %2678 = vmatpush3.bf16.msra.mxu0 %v3014_v11  ;;  %2530 = vmatprep.mubr.msk.f32.mxu0 %vm2880_vm1, %v2881_v1 }
 0x6b8   :  { %2498 = vmatmul.mubr.msk.f32.vlgmr.msra.gmra.mrb[18].mxu1 %vm83_vm0, %v1673_v56  ;;  %2679 = vmatprep.subr.bf16.mxu0 %v2879_v0 }
 0x6b9   :  { %2672 = vmatpush3.bf16.msra.mxu1 %v3003_v5  ;;  %2519 = vmatprep.mubr.msk.f32.mxu1 %vm2880_vm1, %v2881_v1 }
 0x6ba   :  { %2673 = vmatprep.subr.bf16.mxu1 %v2879_v0 }
 0x6bb   :  { %2681 = vmatpush3.bf16.msra.mxu0 %v3021_v17 }
 0x6bd   :  { %2675 = vmatpush3.bf16.msra.mxu1 %v3006_v7  ;;  %v1838_v11 = vld [vmem:[#allocation2] sm:$0xff] }
 0x6be   :  { %2682 = vmatprep.subr.bf16.mxu1 %v2879_v0 }
 0x6c0   :  { %2520 = vmatmul.mubr.msk.f32.vlgmr.msra.gmra.mrb[20].mxu1 %vm83_vm0, %v1838_v11 }
 0x6c1   :  { %2684 = vmatpush3.bf16.msra.mxu1 %v3016_v14  ;;  %2541 = vmatprep.mubr.msk.f32.mxu1 %vm2880_vm1, %v2881_v1 }
 0x6c2   :  { %2685 = vmatprep.subr.bf16.mxu1 %v2879_v0 }
 0x6c5   :  { %2687 = vmatpush3.bf16.msra.mxu1 %v3024_v20 }
 0x789   :  { %v1820_v5 = vpop.f32.mrb[20].mxu0 }
 0x78a   :  { %v2510_v57 = vpop.f32.mrb[21].mxu0 }
 0x78b   :  { %v1747_v58 = vpop.f32.mrb[18].mxu1 }
 0x78c   :  { %v1821_v17 = vadd.f32 %v1820_v5, %v1747_v58  ;;  %v2499_v59 = vpop.f32.mrb[19].mxu1 }
 0x78e   :  { %v1831_v7 = vadd.f32 %v3055_v31, %v1821_v17 }
 0x790   :  { %2725 = vtanh.f32 %v1831_v7 }
 0x793   :  { %v1912_v61 = vpop.f32.mrb[20].mxu1 }
 0x794   :  { %v1916_v62 = vadd.f32 %v1912_v61, %v1837_v60  ;;  %v2521_v63 = vpop.f32.mrb[21].mxu1 }
 0x796   :  { %2727 = vtanh.f32 %v1916_v62 }
 0x79a   :  { %v2726_v14 = vpop.eup %2725 }
 0x79b   :  { %1833 = vst.msk [vmem:[#allocation2 + $0x8] sm:$0xff] %vm83_vm0, %v2726_v14  ;;  %1835 = vst.msk [vmem:[#allocation11 + $0x30] sm:$0xff] %vm83_vm0, %v2726_v14 }
 0x7a0   :  { %v2728_v0 = vpop.eup %2727 }
 0x7a1   :  { %1918 = vst.msk [vmem:[#allocation2] sm:$0xff] %vm83_vm0, %v2728_v0  ;;  %2542 = vmatmul.mubr.msk.f32.vlgmr.msra.gmra.mrb[22].mxu1 %vm83_vm0, %v2728_v0 }
 0x7a2   :  { %v1923_v1 = vld [vmem:[#allocation2 + $0x8] sm:$0xff] }
 0x7a3   :  { %2531 = vmatmul.mubr.msk.f32.vlgmr.msra.gmra.mrb[22].mxu0 %vm83_vm0, %v1923_v1 }
 0x7a8   :  { %v2089_v20 = vld [vmem:[#allocation2] sm:$0xff] }
 0x7a9   :  { %2091 = vst.msk [vmem:[#allocation12] sm:$0xff] %vm83_vm0, %v2089_v20 }
 0x874   :  { %v2070_v2 = vpop.f32.mrb[22].mxu1 }
 0x875   :  { %v2543_v3 = vpop.f32.mrb[23].mxu1 }
 0x876   :  { %v1997_v4 = vpop.f32.mrb[22].mxu0 }
 0x877   :  { %v2071_v6 = vadd.f32 %v2070_v2, %v1997_v4  ;;  %v2532_v8 = vpop.f32.mrb[23].mxu0 }
 0x879   :  { %v2081_v9 = vadd.f32 %v3055_v31, %v2071_v6 }
 0x87b   :  { %2729 = vtanh.f32 %v2081_v9 }
 0x885   :  { %v2730_v10 = vpop.eup %2729 }
 0x886   :  { %2083 = vst.msk [vmem:[#allocation2 + $0x8] sm:$0xff] %vm83_vm0, %v2730_v10  ;;  %2085 = vst.msk [vmem:[#allocation11 + $0x38] sm:$0xff] %vm83_vm0, %v2730_v10 }
 0x887   :  { %2830 = shalt.err (!%p2827_p8)
}
 0x888   :  { %s2831_s27 = scalar_lea.hbm %s3251_s5, 1024 }
 0x889   :  { %p2832_p9 = scmp.ne.s32.totalorder %s3251_s5, %s2831_s27  ;;  %p2835_p10 = scmp.lt.u32.totalorder %s2831_s27, %s3251_s5 }
 0x88b   :  { %p2837_p11 = pnand %p2835_p10, %p2832_p9 }
 0x88d   :  { %2840 = shalt.err (!%p2837_p11)
}
 0x88e   :  { %2104 = dma.vmem_to_hbm [thread:$0]  %s2099_s22, 1024, %s3251_s5, [#allocation5], %s2875_s9, %s2875_s9, %s2876_s10   ;;  %v2090_v31 = vld [vmem:[#allocation2 + $0x8] sm:$0xff] }
 0x88f   :  { %s2883_s0 = smov [#allocation12]   ;;  %2092 = vst.msk [vmem:[#allocation12 + $0x8] sm:$0xff] %vm83_vm0, %v2090_v31 }
 0x890   :  { %s2110_s24 = sshll.u32 %s2883_s0, 4  ;;  %s2111_s24 = int_to_ptr.vmem [resolvable:$true] %s2110_s24 }
 0x891   :  { %s2841_s12 = scalar_lea.vmem %s2111_s24, 256  ;;  %p2846_p13 = scmp.lt.s32.totalorder %s2111_s24, %s2111_s24 }
 0x892   :  { %p2842_p12 = scmp.ne.s32.totalorder %s2111_s24, %s2841_s12  ;;  %p2847_p0 = scmp.lt.s32.totalorder %s2841_s12, %s2841_s12 }
 0x894   :  { %p2848_p1 = por %p2847_p0, %p2846_p13 }
 0x896   :  { %p2849_p2 = pnand %p2848_p1, %p2842_p12 }
 0x898   :  { %2852 = shalt.err (!%p2849_p2)
}
 0x899   :  { %s2853_s15 = scalar_lea.hbm %s3252_s6, 256 }
 0x89a   :  { %p2854_p3 = scmp.ne.s32.totalorder %s3252_s6, %s2853_s15  ;;  %p2857_p4 = scmp.lt.u32.totalorder %s2853_s15, %s3252_s6 }
 0x89c   :  { %p2859_p5 = pnand %p2857_p4, %p2854_p3 }
 0x89e   :  { %2862 = shalt.err (!%p2859_p5)
}
 0x89f   :  { %2116 = dma.vmem_to_hbm [thread:$0]  %s2111_s24, 256, %s3252_s6, [#allocation13], %s2875_s9, %s2875_s9, %s2876_s10  }
 0x8a0   :  { %2869 = dma.done.wait [#allocation5], 1024  }
 0x8a1   :  { %2870 = vsyncadd [#allocation5], 4294966272 }
 0x8a2   :  { %2871 = dma.done.wait [#allocation13], 256  }
 0x8a3   :  { %2872 = vsyncadd [#allocation13], 4294967040 }
 0x8a4   :  { %2123 = vsyncpa [#allocation4], 1 }
 0x8a5   :  { %2124 = vsyncpa [#allocation7], 1 }
 0x8a6   :  { %2125 = vsyncpa [#allocation10], 1 }
 0x8a7   :  { %2126 = vsyncpa [#allocation5], 1 }
 0x8a8   :  { %2127 = vsyncpa [#allocation13], 1 }

</bundles_post_ra>
